<compile_context>
chip_gen: v7x
topology: tpu7x:2x2x1
jax: 0.10.0
libtpu: 0.0.40
codegen_flags: <defaults>
</compile_context>

<pallas_src>
import functools

import jax
import jax.numpy as jnp
from jax import lax
from jax.experimental import pallas as pl
from jax.experimental.pallas import tpu as pltpu


# ----------------------------------------------------------------------------
# Kernel. Grid = (batch_chunks, time_chunks). Per grid step it sees one
# (Tc*Bc, .) time-major slab of x / mask / logits plus the full (resident)
# weight tiles. h/c persist in VMEM scratch across time chunks.
# Gate order (i, f, g, o); each gate is a full Hp-wide lane-aligned block.
# ----------------------------------------------------------------------------
def _moa_lstm_kernel(x_ref, mask_ref, h0_ref, c0_ref, wih_ref, whh_ref, b_ref,
                     wl_ref, bl_ref, logits_ref, hT_ref, cT_ref,
                     h_scr, c_scr, gx_scr, *, steps_total, steps_per_chunk):
    Bc, Hp = h_scr.shape
    Tc = steps_per_chunk
    t_chunk = pl.program_id(1)

    # (re)initialize the carried state at the first time chunk of each batch chunk
    @pl.when(t_chunk == 0)
    def _():
        h_scr[...] = h0_ref[...]
        c_scr[...] = c0_ref[...]

    # Hoisted input projection for the whole chunk: ONE MXU call.
    gx_scr[...] = jnp.dot(x_ref[...], wih_ref[...],
                          preferred_element_type=jnp.float32) + b_ref[...]

    whh = whh_ref[...]
    wl = wl_ref[...]
    bl = bl_ref[...]

    def step(t, carry):
        h, c = carry
        r0 = pl.multiple_of(t * Bc, 8)

        # reset mask (1 - episode_start), stored at 128 lanes, broadcast to Hp here
        m = mask_ref[pl.ds(r0, Bc), :]
        if Hp > 128:
            m = jnp.broadcast_to(m[:, :1], (Bc, Hp))
        h = h * m
        c = c * m

        gates = gx_scr[pl.ds(r0, Bc), :] + jnp.dot(
            h.astype(whh.dtype), whh, preferred_element_type=jnp.float32)
        i_g = jax.nn.sigmoid(gates[:, 0 * Hp:1 * Hp])
        f_g = jax.nn.sigmoid(gates[:, 1 * Hp:2 * Hp])
        g_g = jnp.tanh(gates[:, 2 * Hp:3 * Hp])
        o_g = jax.nn.sigmoid(gates[:, 3 * Hp:4 * Hp])
        c = f_g * c + i_g * g_g
        h = o_g * jnp.tanh(c)

        # Fused logits head for this timestep: lane-dense store straight to the output
        # (fills MXU bubbles of the latency-bound per-step recurrence matmul).
        logits_ref[pl.ds(r0, Bc), :] = jnp.dot(
            h.astype(wl.dtype), wl, preferred_element_type=jnp.float32) + bl

        # Final-state snapshot at the last *real* timestep (time axis may be padded).
        @pl.when(t_chunk * Tc + t == steps_total - 1)
        def _():
            hT_ref[...] = h
            cT_ref[...] = c

        return (h, c)

    h, c = lax.fori_loop(0, Tc, step, (h_scr[...], c_scr[...]), unroll=True)
    h_scr[...] = h
    c_scr[...] = c


# ----------------------------------------------------------------------------
# Build-time weight preparation (done ONCE, not per call).
# ----------------------------------------------------------------------------
def _round_up(x, m):
    return ((x + m - 1) // m) * m


def _prepare_params(params, compute_dtype):
    I, H4 = params["w_ih_t"].shape
    H = H4 // 4
    O = params["wl_t"].shape[1]
    Hp = _round_up(H, 128)
    Op = _round_up(O, 128)

    def pad_gate_cols(w):
        # (rows, 4H) -> (rows, 4*Hp), gate k moved to columns [k*Hp, k*Hp + H)
        out = jnp.zeros((w.shape[0], 4 * Hp), jnp.float32)
        for k in range(4):
            out = out.at[:, k * Hp:k * Hp + H].set(w[:, k * H:(k + 1) * H])
        return out

    wih_p = pad_gate_cols(params["w_ih_t"]).astype(compute_dtype)                # (I, 4Hp)
    whh_p = jnp.zeros((Hp, 4 * Hp), jnp.float32).at[:H, :].set(
        pad_gate_cols(params["w_hh_t"])).astype(compute_dtype)                   # (Hp, 4Hp)
    b_p = pad_gate_cols(params["b_lstm"])                                        # (1, 4Hp) f32
    wl_p = jnp.zeros((Hp, Op), jnp.float32).at[:H, :O].set(
        params["wl_t"]).astype(compute_dtype)                                    # (Hp, Op)
    bl_p = jnp.zeros((1, Op), jnp.float32).at[:, :O].set(params["bl"])           # (1, Op)
    weights = (wih_p, whh_p, b_p, wl_p, bl_p)
    dims = dict(I=I, H=H, O=O, Hp=Hp, Op=Op)
    return weights, dims


def make_moa_lstm_forward(params, *, compute_dtype=jnp.float32, time_chunk=8):
    """Returns a jitted forward(features, lstm_states, episode_starts) with weights
    already padded to MXU-friendly layout (padding cost paid once, here)."""
    weights, dims = _prepare_params(params, compute_dtype)

    def forward(features, lstm_states, episode_starts):
        return _moa_lstm_forward_impl(
            weights, features, lstm_states, episode_starts,
            compute_dtype=compute_dtype, time_chunk=time_chunk, **dims)

    return jax.jit(forward)


# ----------------------------------------------------------------------------
# Per-call wrapper: activation padding / layout plumbing around the pallas_call.
# ----------------------------------------------------------------------------
def _moa_lstm_forward_impl(weights, features, lstm_states, episode_starts, *,
                           I, H, O, Hp, Op, compute_dtype, time_chunk):
    wih_p, whh_p, b_p, wl_p, bl_p = weights
    h0_full, c0_full = lstm_states
    B = h0_full.shape[1]
    T = features.shape[0] // B

    # Same reshapes as the torch module (batch-major flat -> time-major).
    x_tbi = features.reshape(B, T, I).swapaxes(0, 1).astype(compute_dtype)     # (T,B,I)
    ep_tb = episode_starts.reshape(B, T).swapaxes(0, 1).astype(jnp.float32)    # (T,B)

    # Batch tiling: split across TensorCores (parallel grid axis) when big enough.
    B8 = _round_up(B, 8)
    Bc = _round_up((B8 + 1) // 2, 8) if B8 >= 16 else B8
    nb = -(-B8 // Bc)
    Bp = nb * Bc

    # Time chunking bounds the resident VMEM footprint and pipelines x/mask DMA.
    Tc = min(time_chunk, T)
    T_pad = _round_up(T, Tc)
    nt = T_pad // Tc

    # --- pad activations (padded batch rows / timesteps get mask = 0) ---
    x_pad = jnp.zeros((T_pad, Bp, I), compute_dtype).at[:T, :B, :].set(x_tbi)
    x_flat = x_pad.reshape(T_pad * Bp, I)
    mask_tb = jnp.zeros((T_pad, Bp), jnp.float32).at[:T, :B].set(1.0 - ep_tb)
    mask = jnp.broadcast_to(mask_tb[:, :, None],
                            (T_pad, Bp, 128)).reshape(T_pad * Bp, 128)

    h0p = jnp.zeros((Bp, Hp), jnp.float32).at[:B, :H].set(h0_full[0].astype(jnp.float32))
    c0p = jnp.zeros((Bp, Hp), jnp.float32).at[:B, :H].set(c0_full[0].astype(jnp.float32))

    # Row blocks of size Bc; rows are time-major then batch.
    row_map = lambda b, t: (t * nb + b, 0)
    bat_map = lambda b, t: (b, 0)
    w_map = lambda b, t: (0, 0)

    cd = jnp.dtype(compute_dtype).itemsize
    w_bytes = (I * 4 * Hp + Hp * 4 * Hp + Hp * Op) * cd + (4 * Hp + Op) * 4
    flops = 2 * T_pad * Bp * (I * 4 * Hp + Hp * 4 * Hp + Hp * Op)
    transcendentals = 5 * T_pad * Bp * Hp
    bytes_accessed = (T_pad * Bp * (I * cd + 128 * 4 + Op * 4)
                      + 4 * Bp * Hp * 4 + w_bytes)
    vmem_est = (2 * Tc * Bc * (I * cd + 128 * 4 + Op * 4)     # pipelined x/mask/logits
                + 4 * 2 * Bc * Hp * 4                          # h0/c0/hT/cT blocks
                + w_bytes                                      # resident weights
                + Tc * Bc * 4 * Hp * 4 + 2 * Bc * Hp * 4)      # scratch (gx, h, c)
    vmem_limit = int(min(max(2 * vmem_est + (1 << 20), 8 << 20), 64 << 20))

    kernel = functools.partial(_moa_lstm_kernel,
                               steps_total=T, steps_per_chunk=Tc)

    logits_full, hTp, cTp = pl.pallas_call(
        kernel,
        grid_spec=pltpu.PrefetchScalarGridSpec(
            num_scalar_prefetch=0,
            grid=(nb, nt),
            in_specs=[
                pl.BlockSpec((Tc * Bc, I), row_map),        # x
                pl.BlockSpec((Tc * Bc, 128), row_map),      # reset mask (128 lanes)
                pl.BlockSpec((Bc, Hp), bat_map),            # h0
                pl.BlockSpec((Bc, Hp), bat_map),            # c0
                pl.BlockSpec((I, 4 * Hp), w_map),           # W_ih
                pl.BlockSpec((Hp, 4 * Hp), w_map),          # W_hh
                pl.BlockSpec((1, 4 * Hp), w_map),           # b
                pl.BlockSpec((Hp, Op), w_map),              # W_logits
                pl.BlockSpec((1, Op), w_map),               # b_logits
            ],
            out_specs=[
                pl.BlockSpec((Tc * Bc, Op), row_map),       # logits
                pl.BlockSpec((Bc, Hp), bat_map),            # hT
                pl.BlockSpec((Bc, Hp), bat_map),            # cT
            ],
            scratch_shapes=[
                pltpu.VMEM((Bc, Hp), jnp.float32),          # carried h
                pltpu.VMEM((Bc, Hp), jnp.float32),          # carried c
                pltpu.VMEM((Tc * Bc, 4 * Hp), jnp.float32),  # per-chunk x-projection
            ],
        ),
        out_shape=(
            jax.ShapeDtypeStruct((T_pad * Bp, Op), jnp.float32),
            jax.ShapeDtypeStruct((Bp, Hp), jnp.float32),
            jax.ShapeDtypeStruct((Bp, Hp), jnp.float32),
        ),
        compiler_params=pltpu.CompilerParams(
            dimension_semantics=("parallel", "arbitrary"),
            vmem_limit_bytes=vmem_limit),
        cost_estimate=pl.CostEstimate(flops=flops,
                                      transcendentals=transcendentals,
                                      bytes_accessed=bytes_accessed),
    )(x_flat, mask, h0p, c0p, wih_p, whh_p, b_p, wl_p, bl_p)

    # Time-major (T_pad*Bp, Op) -> batch-major flat (B*T, O), matching
    # th.flatten(lstm_output.transpose(0, 1), 0, 1) followed by the Linear head.
    logits = (logits_full.reshape(T_pad, Bp, Op)[:T, :B, :O]
              .swapaxes(0, 1).reshape(B * T, O))
    new_states = (hTp[:B, :H][None], cTp[:B, :H][None])
    return logits, new_states


# ----------------------------------------------------------------------------
# Pure-JAX reference (for verification).
# ----------------------------------------------------------------------------
def moa_lstm_reference(params, features, lstm_states, episode_starts):
    h0, c0 = lstm_states[0][0], lstm_states[1][0]
    B, H = h0.shape
    I = params["w_ih_t"].shape[0]
    x_tbi = features.reshape(B, -1, I).swapaxes(0, 1)
    ep = episode_starts.reshape(B, -1).swapaxes(0, 1)

    def step(carry, inp):
        h, c = carry
        x_t, e_t = inp
        m = (1.0 - e_t)[:, None]
        h = h * m
        c = c * m
        gates = x_t @ params["w_ih_t"] + h @ params["w_hh_t"] + params["b_lstm"][0]
        i_g = jax.nn.sigmoid(gates[:, 0 * H:1 * H])
        f_g = jax.nn.sigmoid(gates[:, 1 * H:2 * H])
        g_g = jnp.tanh(gates[:, 2 * H:3 * H])
        o_g = jax.nn.sigmoid(gates[:, 3 * H:4 * H])
        c = f_g * c + i_g * g_g
        h = o_g * jnp.tanh(c)
        return (h, c), h

    (hT, cT), outs = lax.scan(step, (h0, c0), (x_tbi, ep))
    T = x_tbi.shape[0]
    lstm_out = outs.swapaxes(0, 1).reshape(B * T, H)
    logits = lstm_out @ params["wl_t"] + params["bl"][0]
    return logits, (hT[None], cT[None])


# ----------------------------------------------------------------------------
def init_params(key, in_size, cell_size, num_outputs):
    ks = jax.random.split(key, 5)
    s = 0.1
    return {
        # LSTM weights pre-transposed for x @ W form. Gate order: i, f, g, o.
        "w_ih_t": s * jax.random.normal(ks[0], (in_size, 4 * cell_size), jnp.float32),
        "w_hh_t": s * jax.random.normal(ks[1], (cell_size, 4 * cell_size), jnp.float32),
        # b_ih + b_hh folded into one bias row.
        "b_lstm": s * jax.random.normal(ks[2], (1, 4 * cell_size), jnp.float32),
        # logits head
        "wl_t": s * jax.random.normal(ks[3], (cell_size, num_outputs), jnp.float32),
        "bl": s * jax.random.normal(ks[4], (1, num_outputs), jnp.float32),
    }


if __name__ == "__main__":
    # MOALSTM sizes: in_size = num_features + (num_other_agents + 1) * num_actions
    num_features, num_actions, num_other_agents = 8, 4, 1
    in_size = num_features + (num_other_agents + 1) * num_actions   # 16
    cell_size = 32
    num_outputs = (num_other_agents + 1) * num_actions              # 8
    n_seq = 2          # parallel sequences (envs)
    T = 8              # timesteps per sequence

    key = jax.random.PRNGKey(0)
    kp, kf, kh, kc = jax.random.split(key, 4)
    params = init_params(kp, in_size, cell_size, num_outputs)

    features = jax.random.normal(kf, (n_seq * T, in_size), jnp.float32)
    h0 = jax.random.normal(kh, (1, n_seq, cell_size), jnp.float32)
    c0 = jax.random.normal(kc, (1, n_seq, cell_size), jnp.float32)

    # episode starts: new episode at t=0 for all seqs, and one mid-sequence reset.
    ep = jnp.zeros((n_seq, T), jnp.float32).at[:, 0].set(1.0).at[1, 4].set(1.0)
    episode_starts = ep.reshape(-1)   # batch-major flat, as the torch module expects

    r_logits, (r_hT, r_cT) = moa_lstm_reference(params, features, (h0, c0),
                                                episode_starts)

    # --- f32 MXU operands: exact-semantics path ---
    fwd_f32 = make_moa_lstm_forward(params, compute_dtype=jnp.float32, time_chunk=8)
    logits, (hT, cT) = fwd_f32(features, (h0, c0), episode_starts)
    jax.block_until_ready((logits, hT, cT))
    assert logits.shape == (n_seq * T, num_outputs)
    assert hT.shape == (1, n_seq, cell_size) and cT.shape == (1, n_seq, cell_size)
    assert jnp.allclose(logits, r_logits, atol=1e-4)
    assert jnp.allclose(hT, r_hT, atol=1e-4)
    assert jnp.allclose(cT, r_cT, atol=1e-4)

    # --- bf16 MXU operands (v6e/v7x fast path): f32 accumulation / gate math ---
    fwd_bf16 = make_moa_lstm_forward(params, compute_dtype=jnp.bfloat16, time_chunk=8)
    logits_b, (hT_b, cT_b) = fwd_bf16(features, (h0, c0), episode_starts)
    jax.block_until_ready((logits_b, hT_b, cT_b))
    assert jnp.allclose(logits_b, r_logits, atol=2e-2)
    assert jnp.allclose(hT_b, r_hT, atol=2e-2)
    assert jnp.allclose(cT_b, r_cT, atol=2e-2)

    print("KERNEL_OK")
</pallas_src>

<mosaic_0001>
module attributes {stable_mosaic.version = 11 : i64} {
  func.func @_moa_lstm_kernel(%arg0: i32, %arg1: i32, %arg2: memref<64x16xf32, #tpu.memory_space<vmem>>, %arg3: memref<64x128xf32, #tpu.memory_space<vmem>>, %arg4: memref<8x128xf32, #tpu.memory_space<vmem>>, %arg5: memref<8x128xf32, #tpu.memory_space<vmem>>, %arg6: memref<16x512xf32, #tpu.memory_space<vmem>>, %arg7: memref<128x512xf32, #tpu.memory_space<vmem>>, %arg8: memref<1x512xf32, #tpu.memory_space<vmem>>, %arg9: memref<128x128xf32, #tpu.memory_space<vmem>>, %arg10: memref<1x128xf32, #tpu.memory_space<vmem>>, %arg11: memref<64x128xf32, #tpu.memory_space<vmem>>, %arg12: memref<8x128xf32, #tpu.memory_space<vmem>>, %arg13: memref<8x128xf32, #tpu.memory_space<vmem>>, %arg14: memref<8x128xf32, #tpu.memory_space<vmem>>, %arg15: memref<8x128xf32, #tpu.memory_space<vmem>>, %arg16: memref<64x512xf32, #tpu.memory_space<vmem>>) attributes {dimension_semantics = [#tpu.dimension_semantics<parallel>, #tpu.dimension_semantics<arbitrary>], iteration_bounds = array<i64: 1, 1>, scalar_prefetch = 0 : i64, scratch_operands = 3 : i64, tpu.core_type = #tpu.core_type<tc>, window_params = [{transform_indices = @transform_0, window_bounds = array<i64: 64, 16>}, {transform_indices = @transform_1, window_bounds = array<i64: 64, 128>}, {transform_indices = @transform_2, window_bounds = array<i64: 8, 128>}, {transform_indices = @transform_3, window_bounds = array<i64: 8, 128>}, {pipeline_mode = #tpu.pipeline_mode<synchronous>, transform_indices = @transform_4, window_bounds = array<i64: 16, 512>}, {pipeline_mode = #tpu.pipeline_mode<synchronous>, transform_indices = @transform_5, window_bounds = array<i64: 128, 512>}, {pipeline_mode = #tpu.pipeline_mode<synchronous>, transform_indices = @transform_6, window_bounds = array<i64: 1, 512>}, {pipeline_mode = #tpu.pipeline_mode<synchronous>, transform_indices = @transform_7, window_bounds = array<i64: 128, 128>}, {pipeline_mode = #tpu.pipeline_mode<synchronous>, transform_indices = @transform_8, window_bounds = array<i64: 1, 128>}, {transform_indices = @transform_9, window_bounds = array<i64: 64, 128>}, {transform_indices = @transform_10, window_bounds = array<i64: 8, 128>}, {transform_indices = @transform_11, window_bounds = array<i64: 8, 128>}]} {
    %c0_i32 = arith.constant 0 : i32
    %0 = arith.cmpi eq, %arg1, %c0_i32 : i32
    %1 = arith.extui %0 : i1 to i32
    %c0_i32_0 = arith.constant 0 : i32
    %2 = arith.cmpi ne, %1, %c0_i32_0 : i32
    scf.if %2 {
      %c0_119 = arith.constant 0 : index
      %c0_120 = arith.constant 0 : index
      %377 = vector.load %arg4[%c0_119, %c0_120] : memref<8x128xf32, #tpu.memory_space<vmem>>, vector<8x128xf32>
      %c0_121 = arith.constant 0 : index
      %c0_122 = arith.constant 0 : index
      %378 = vector.load %arg14[%c0_121, %c0_122] : memref<8x128xf32, #tpu.memory_space<vmem>>, vector<8x128xf32>
      tpu.vector_store %arg14[%c0_121, %c0_122], %377 {strides = array<i32>} : memref<8x128xf32, #tpu.memory_space<vmem>>, vector<8x128xf32>,
      %c0_123 = arith.constant 0 : index
      %c0_124 = arith.constant 0 : index
      %379 = vector.load %arg5[%c0_123, %c0_124] : memref<8x128xf32, #tpu.memory_space<vmem>>, vector<8x128xf32>
      %c0_125 = arith.constant 0 : index
      %c0_126 = arith.constant 0 : index
      %380 = vector.load %arg15[%c0_125, %c0_126] : memref<8x128xf32, #tpu.memory_space<vmem>>, vector<8x128xf32>
      tpu.vector_store %arg15[%c0_125, %c0_126], %379 {strides = array<i32>} : memref<8x128xf32, #tpu.memory_space<vmem>>, vector<8x128xf32>,
    } else {
    }
    %c0 = arith.constant 0 : index
    %c0_1 = arith.constant 0 : index
    %3 = vector.load %arg2[%c0, %c0_1] : memref<64x16xf32, #tpu.memory_space<vmem>>, vector<64x16xf32>
    %c0_2 = arith.constant 0 : index
    %c0_3 = arith.constant 0 : index
    %4 = vector.load %arg6[%c0_2, %c0_3] : memref<16x512xf32, #tpu.memory_space<vmem>>, vector<16x512xf32>
    %cst = arith.constant dense<0.000000e+00> : vector<64x512xf32>
    %5 = tpu.matmul %3, %4, %cst {dimension_numbers = #tpu.dot_dimension_numbers<[1], [0], [0], [1], [0, 0, 1, 1], [], []>} : vector<64x16xf32>, vector<16x512xf32>, vector<64x512xf32> -> vector<64x512xf32>
    %c0_4 = arith.constant 0 : index
    %c0_5 = arith.constant 0 : index
    %6 = vector.load %arg8[%c0_4, %c0_5] : memref<1x512xf32, #tpu.memory_space<vmem>>, vector<1x512xf32>
    %7 = vector.broadcast %6 : vector<1x512xf32> to vector<64x512xf32>
    %8 = arith.addf %5, %7 : vector<64x512xf32>
    %c0_6 = arith.constant 0 : index
    %c0_7 = arith.constant 0 : index
    %9 = vector.load %arg16[%c0_6, %c0_7] : memref<64x512xf32, #tpu.memory_space<vmem>>, vector<64x512xf32>
    tpu.vector_store %arg16[%c0_6, %c0_7], %8 {strides = array<i32>} : memref<64x512xf32, #tpu.memory_space<vmem>>, vector<64x512xf32>,
    %c0_8 = arith.constant 0 : index
    %c0_9 = arith.constant 0 : index
    %10 = vector.load %arg7[%c0_8, %c0_9] : memref<128x512xf32, #tpu.memory_space<vmem>>, vector<128x512xf32>
    %c0_10 = arith.constant 0 : index
    %c0_11 = arith.constant 0 : index
    %11 = vector.load %arg9[%c0_10, %c0_11] : memref<128x128xf32, #tpu.memory_space<vmem>>, vector<128x128xf32>
    %c0_12 = arith.constant 0 : index
    %c0_13 = arith.constant 0 : index
    %12 = vector.load %arg10[%c0_12, %c0_13] : memref<1x128xf32, #tpu.memory_space<vmem>>, vector<1x128xf32>
    %c0_14 = arith.constant 0 : index
    %c0_15 = arith.constant 0 : index
    %13 = vector.load %arg14[%c0_14, %c0_15] : memref<8x128xf32, #tpu.memory_space<vmem>>, vector<8x128xf32>
    %c0_16 = arith.constant 0 : index
    %c0_17 = arith.constant 0 : index
    %14 = vector.load %arg15[%c0_16, %c0_17] : memref<8x128xf32, #tpu.memory_space<vmem>>, vector<8x128xf32>
    %c0_i32_18 = arith.constant 0 : i32
    %c8_i32 = arith.constant 8 : i32
    %15 = arith.muli %c0_i32_18, %c8_i32 : i32
    %16 = tpu.assume_multiple %15, 8 : i32
    %17 = arith.index_cast %16 : i32 to index
    %c0_19 = arith.constant 0 : index
    %18 = vector.load %arg3[%17, %c0_19] : memref<64x128xf32, #tpu.memory_space<vmem>>, vector<8x128xf32>
    %19 = arith.mulf %13, %18 : vector<8x128xf32>
    %20 = arith.mulf %14, %18 : vector<8x128xf32>
    %21 = arith.index_cast %16 : i32 to index
    %c0_20 = arith.constant 0 : index
    %22 = vector.load %arg16[%21, %c0_20] : memref<64x512xf32, #tpu.memory_space<vmem>>, vector<8x512xf32>
    %cst_21 = arith.constant dense<0.000000e+00> : vector<8x512xf32>
    %23 = tpu.matmul %19, %10, %cst_21 {dimension_numbers = #tpu.dot_dimension_numbers<[1], [0], [0], [1], [0, 0, 1, 1], [], []>} : vector<8x128xf32>, vector<128x512xf32>, vector<8x512xf32> -> vector<8x512xf32>
    %24 = arith.addf %22, %23 : vector<8x512xf32>
    %25 = vector.extract_strided_slice %24 {offsets = [0, 0], sizes = [8, 128], strides = [1, 1]} : vector<8x512xf32> to vector<8x128xf32>
    %26 = arith.negf %25 : vector<8x128xf32>
    %27 = math.exp %26 : vector<8x128xf32>
    %cst_22 = arith.constant 1.000000e+00 : f32
    %28 = vector.broadcast %cst_22 : f32 to vector<8x128xf32>
    %29 = arith.addf %28, %27 : vector<8x128xf32>
    %30 = arith.divf %28, %29 : vector<8x128xf32>
    %31 = vector.extract_strided_slice %24 {offsets = [0, 128], sizes = [8, 128], strides = [1, 1]} : vector<8x512xf32> to vector<8x128xf32>
    %32 = arith.negf %31 : vector<8x128xf32>
    %33 = math.exp %32 : vector<8x128xf32>
    %cst_23 = arith.constant 1.000000e+00 : f32
    %34 = vector.broadcast %cst_23 : f32 to vector<8x128xf32>
    %35 = arith.addf %34, %33 : vector<8x128xf32>
    %36 = arith.divf %34, %35 : vector<8x128xf32>
    %37 = vector.extract_strided_slice %24 {offsets = [0, 256], sizes = [8, 128], strides = [1, 1]} : vector<8x512xf32> to vector<8x128xf32>
    %38 = math.tanh %37 : vector<8x128xf32>
    %39 = vector.extract_strided_slice %24 {offsets = [0, 384], sizes = [8, 128], strides = [1, 1]} : vector<8x512xf32> to vector<8x128xf32>
    %40 = arith.negf %39 : vector<8x128xf32>
    %41 = math.exp %40 : vector<8x128xf32>
    %cst_24 = arith.constant 1.000000e+00 : f32
    %42 = vector.broadcast %cst_24 : f32 to vector<8x128xf32>
    %43 = arith.addf %42, %41 : vector<8x128xf32>
    %44 = arith.divf %42, %43 : vector<8x128xf32>
    %45 = arith.mulf %36, %20 : vector<8x128xf32>
    %46 = arith.mulf %30, %38 : vector<8x128xf32>
    %47 = arith.addf %45, %46 : vector<8x128xf32>
    %48 = math.tanh %47 : vector<8x128xf32>
    %49 = arith.mulf %44, %48 : vector<8x128xf32>
    %cst_25 = arith.constant dense<0.000000e+00> : vector<8x128xf32>
    %50 = tpu.matmul %49, %11, %cst_25 {dimension_numbers = #tpu.dot_dimension_numbers<[1], [0], [0], [1], [0, 0, 1, 1], [], []>} : vector<8x128xf32>, vector<128x128xf32>, vector<8x128xf32> -> vector<8x128xf32>
    %51 = vector.broadcast %12 : vector<1x128xf32> to vector<8x128xf32>
    %52 = arith.addf %50, %51 : vector<8x128xf32>
    %53 = arith.index_cast %16 : i32 to index
    %c0_26 = arith.constant 0 : index
    %54 = vector.load %arg11[%53, %c0_26] : memref<64x128xf32, #tpu.memory_space<vmem>>, vector<8x128xf32>
    tpu.vector_store %arg11[%53, %c0_26], %52 {strides = array<i32>} : memref<64x128xf32, #tpu.memory_space<vmem>>, vector<8x128xf32>,
    %c8_i32_27 = arith.constant 8 : i32
    %55 = arith.muli %arg1, %c8_i32_27 : i32
    %56 = arith.addi %55, %c0_i32_18 : i32
    %c7_i32 = arith.constant 7 : i32
    %57 = arith.cmpi eq, %56, %c7_i32 : i32
    %58 = arith.extui %57 : i1 to i32
    %c0_i32_28 = arith.constant 0 : i32
    %59 = arith.cmpi ne, %58, %c0_i32_28 : i32
    scf.if %59 {
      %c0_119 = arith.constant 0 : index
      %c0_120 = arith.constant 0 : index
      %377 = vector.load %arg12[%c0_119, %c0_120] : memref<8x128xf32, #tpu.memory_space<vmem>>, vector<8x128xf32>
      tpu.vector_store %arg12[%c0_119, %c0_120], %49 {strides = array<i32>} : memref<8x128xf32, #tpu.memory_space<vmem>>, vector<8x128xf32>,
      %c0_121 = arith.constant 0 : index
      %c0_122 = arith.constant 0 : index
      %378 = vector.load %arg13[%c0_121, %c0_122] : memref<8x128xf32, #tpu.memory_space<vmem>>, vector<8x128xf32>
      tpu.vector_store %arg13[%c0_121, %c0_122], %47 {strides = array<i32>} : memref<8x128xf32, #tpu.memory_space<vmem>>, vector<8x128xf32>,
    } else {
    }
    %c1_i32 = arith.constant 1 : i32
    %c8_i32_29 = arith.constant 8 : i32
    %60 = arith.muli %c1_i32, %c8_i32_29 : i32
    %61 = tpu.assume_multiple %60, 8 : i32
    %62 = arith.index_cast %61 : i32 to index
    %c0_30 = arith.constant 0 : index
    %63 = vector.load %arg3[%62, %c0_30] : memref<64x128xf32, #tpu.memory_space<vmem>>, vector<8x128xf32>
    %64 = arith.mulf %49, %63 : vector<8x128xf32>
    %65 = arith.mulf %47, %63 : vector<8x128xf32>
    %66 = arith.index_cast %61 : i32 to index
    %c0_31 = arith.constant 0 : index
    %67 = vector.load %arg16[%66, %c0_31] : memref<64x512xf32, #tpu.memory_space<vmem>>, vector<8x512xf32>
    %cst_32 = arith.constant dense<0.000000e+00> : vector<8x512xf32>
    %68 = tpu.matmul %64, %10, %cst_32 {dimension_numbers = #tpu.dot_dimension_numbers<[1], [0], [0], [1], [0, 0, 1, 1], [], []>} : vector<8x128xf32>, vector<128x512xf32>, vector<8x512xf32> -> vector<8x512xf32>
    %69 = arith.addf %67, %68 : vector<8x512xf32>
    %70 = vector.extract_strided_slice %69 {offsets = [0, 0], sizes = [8, 128], strides = [1, 1]} : vector<8x512xf32> to vector<8x128xf32>
    %71 = arith.negf %70 : vector<8x128xf32>
    %72 = math.exp %71 : vector<8x128xf32>
    %cst_33 = arith.constant 1.000000e+00 : f32
    %73 = vector.broadcast %cst_33 : f32 to vector<8x128xf32>
    %74 = arith.addf %73, %72 : vector<8x128xf32>
    %75 = arith.divf %73, %74 : vector<8x128xf32>
    %76 = vector.extract_strided_slice %69 {offsets = [0, 128], sizes = [8, 128], strides = [1, 1]} : vector<8x512xf32> to vector<8x128xf32>
    %77 = arith.negf %76 : vector<8x128xf32>
    %78 = math.exp %77 : vector<8x128xf32>
    %cst_34 = arith.constant 1.000000e+00 : f32
    %79 = vector.broadcast %cst_34 : f32 to vector<8x128xf32>
    %80 = arith.addf %79, %78 : vector<8x128xf32>
    %81 = arith.divf %79, %80 : vector<8x128xf32>
    %82 = vector.extract_strided_slice %69 {offsets = [0, 256], sizes = [8, 128], strides = [1, 1]} : vector<8x512xf32> to vector<8x128xf32>
    %83 = math.tanh %82 : vector<8x128xf32>
    %84 = vector.extract_strided_slice %69 {offsets = [0, 384], sizes = [8, 128], strides = [1, 1]} : vector<8x512xf32> to vector<8x128xf32>
    %85 = arith.negf %84 : vector<8x128xf32>
    %86 = math.exp %85 : vector<8x128xf32>
    %cst_35 = arith.constant 1.000000e+00 : f32
    %87 = vector.broadcast %cst_35 : f32 to vector<8x128xf32>
    %88 = arith.addf %87, %86 : vector<8x128xf32>
    %89 = arith.divf %87, %88 : vector<8x128xf32>
    %90 = arith.mulf %81, %65 : vector<8x128xf32>
    %91 = arith.mulf %75, %83 : vector<8x128xf32>
    %92 = arith.addf %90, %91 : vector<8x128xf32>
    %93 = math.tanh %92 : vector<8x128xf32>
    %94 = arith.mulf %89, %93 : vector<8x128xf32>
    %cst_36 = arith.constant dense<0.000000e+00> : vector<8x128xf32>
    %95 = tpu.matmul %94, %11, %cst_36 {dimension_numbers = #tpu.dot_dimension_numbers<[1], [0], [0], [1], [0, 0, 1, 1], [], []>} : vector<8x128xf32>, vector<128x128xf32>, vector<8x128xf32> -> vector<8x128xf32>
    %96 = vector.broadcast %12 : vector<1x128xf32> to vector<8x128xf32>
    %97 = arith.addf %95, %96 : vector<8x128xf32>
    %98 = arith.index_cast %61 : i32 to index
    %c0_37 = arith.constant 0 : index
    %99 = vector.load %arg11[%98, %c0_37] : memref<64x128xf32, #tpu.memory_space<vmem>>, vector<8x128xf32>
    tpu.vector_store %arg11[%98, %c0_37], %97 {strides = array<i32>} : memref<64x128xf32, #tpu.memory_space<vmem>>, vector<8x128xf32>,
    %c8_i32_38 = arith.constant 8 : i32
    %100 = arith.muli %arg1, %c8_i32_38 : i32
    %101 = arith.addi %100, %c1_i32 : i32
    %c7_i32_39 = arith.constant 7 : i32
    %102 = arith.cmpi eq, %101, %c7_i32_39 : i32
    %103 = arith.extui %102 : i1 to i32
    %c0_i32_40 = arith.constant 0 : i32
    %104 = arith.cmpi ne, %103, %c0_i32_40 : i32
    scf.if %104 {
      %c0_119 = arith.constant 0 : index
      %c0_120 = arith.constant 0 : index
      %377 = vector.load %arg12[%c0_119, %c0_120] : memref<8x128xf32, #tpu.memory_space<vmem>>, vector<8x128xf32>
      tpu.vector_store %arg12[%c0_119, %c0_120], %94 {strides = array<i32>} : memref<8x128xf32, #tpu.memory_space<vmem>>, vector<8x128xf32>,
      %c0_121 = arith.constant 0 : index
      %c0_122 = arith.constant 0 : index
      %378 = vector.load %arg13[%c0_121, %c0_122] : memref<8x128xf32, #tpu.memory_space<vmem>>, vector<8x128xf32>
      tpu.vector_store %arg13[%c0_121, %c0_122], %92 {strides = array<i32>} : memref<8x128xf32, #tpu.memory_space<vmem>>, vector<8x128xf32>,
    } else {
    }
    %c2_i32 = arith.constant 2 : i32
    %c8_i32_41 = arith.constant 8 : i32
    %105 = arith.muli %c2_i32, %c8_i32_41 : i32
    %106 = tpu.assume_multiple %105, 8 : i32
    %107 = arith.index_cast %106 : i32 to index
    %c0_42 = arith.constant 0 : index
    %108 = vector.load %arg3[%107, %c0_42] : memref<64x128xf32, #tpu.memory_space<vmem>>, vector<8x128xf32>
    %109 = arith.mulf %94, %108 : vector<8x128xf32>
    %110 = arith.mulf %92, %108 : vector<8x128xf32>
    %111 = arith.index_cast %106 : i32 to index
    %c0_43 = arith.constant 0 : index
    %112 = vector.load %arg16[%111, %c0_43] : memref<64x512xf32, #tpu.memory_space<vmem>>, vector<8x512xf32>
    %cst_44 = arith.constant dense<0.000000e+00> : vector<8x512xf32>
    %113 = tpu.matmul %109, %10, %cst_44 {dimension_numbers = #tpu.dot_dimension_numbers<[1], [0], [0], [1], [0, 0, 1, 1], [], []>} : vector<8x128xf32>, vector<128x512xf32>, vector<8x512xf32> -> vector<8x512xf32>
    %114 = arith.addf %112, %113 : vector<8x512xf32>
    %115 = vector.extract_strided_slice %114 {offsets = [0, 0], sizes = [8, 128], strides = [1, 1]} : vector<8x512xf32> to vector<8x128xf32>
    %116 = arith.negf %115 : vector<8x128xf32>
    %117 = math.exp %116 : vector<8x128xf32>
    %cst_45 = arith.constant 1.000000e+00 : f32
    %118 = vector.broadcast %cst_45 : f32 to vector<8x128xf32>
    %119 = arith.addf %118, %117 : vector<8x128xf32>
    %120 = arith.divf %118, %119 : vector<8x128xf32>
    %121 = vector.extract_strided_slice %114 {offsets = [0, 128], sizes = [8, 128], strides = [1, 1]} : vector<8x512xf32> to vector<8x128xf32>
    %122 = arith.negf %121 : vector<8x128xf32>
    %123 = math.exp %122 : vector<8x128xf32>
    %cst_46 = arith.constant 1.000000e+00 : f32
    %124 = vector.broadcast %cst_46 : f32 to vector<8x128xf32>
    %125 = arith.addf %124, %123 : vector<8x128xf32>
    %126 = arith.divf %124, %125 : vector<8x128xf32>
    %127 = vector.extract_strided_slice %114 {offsets = [0, 256], sizes = [8, 128], strides = [1, 1]} : vector<8x512xf32> to vector<8x128xf32>
    %128 = math.tanh %127 : vector<8x128xf32>
    %129 = vector.extract_strided_slice %114 {offsets = [0, 384], sizes = [8, 128], strides = [1, 1]} : vector<8x512xf32> to vector<8x128xf32>
    %130 = arith.negf %129 : vector<8x128xf32>
    %131 = math.exp %130 : vector<8x128xf32>
    %cst_47 = arith.constant 1.000000e+00 : f32
    %132 = vector.broadcast %cst_47 : f32 to vector<8x128xf32>
    %133 = arith.addf %132, %131 : vector<8x128xf32>
    %134 = arith.divf %132, %133 : vector<8x128xf32>
    %135 = arith.mulf %126, %110 : vector<8x128xf32>
    %136 = arith.mulf %120, %128 : vector<8x128xf32>
    %137 = arith.addf %135, %136 : vector<8x128xf32>
    %138 = math.tanh %137 : vector<8x128xf32>
    %139 = arith.mulf %134, %138 : vector<8x128xf32>
    %cst_48 = arith.constant dense<0.000000e+00> : vector<8x128xf32>
    %140 = tpu.matmul %139, %11, %cst_48 {dimension_numbers = #tpu.dot_dimension_numbers<[1], [0], [0], [1], [0, 0, 1, 1], [], []>} : vector<8x128xf32>, vector<128x128xf32>, vector<8x128xf32> -> vector<8x128xf32>
    %141 = vector.broadcast %12 : vector<1x128xf32> to vector<8x128xf32>
    %142 = arith.addf %140, %141 : vector<8x128xf32>
    %143 = arith.index_cast %106 : i32 to index
    %c0_49 = arith.constant 0 : index
    %144 = vector.load %arg11[%143, %c0_49] : memref<64x128xf32, #tpu.memory_space<vmem>>, vector<8x128xf32>
    tpu.vector_store %arg11[%143, %c0_49], %142 {strides = array<i32>} : memref<64x128xf32, #tpu.memory_space<vmem>>, vector<8x128xf32>,
    %c8_i32_50 = arith.constant 8 : i32
    %145 = arith.muli %arg1, %c8_i32_50 : i32
    %146 = arith.addi %145, %c2_i32 : i32
    %c7_i32_51 = arith.constant 7 : i32
    %147 = arith.cmpi eq, %146, %c7_i32_51 : i32
    %148 = arith.extui %147 : i1 to i32
    %c0_i32_52 = arith.constant 0 : i32
    %149 = arith.cmpi ne, %148, %c0_i32_52 : i32
    scf.if %149 {
      %c0_119 = arith.constant 0 : index
      %c0_120 = arith.constant 0 : index
      %377 = vector.load %arg12[%c0_119, %c0_120] : memref<8x128xf32, #tpu.memory_space<vmem>>, vector<8x128xf32>
      tpu.vector_store %arg12[%c0_119, %c0_120], %139 {strides = array<i32>} : memref<8x128xf32, #tpu.memory_space<vmem>>, vector<8x128xf32>,
      %c0_121 = arith.constant 0 : index
      %c0_122 = arith.constant 0 : index
      %378 = vector.load %arg13[%c0_121, %c0_122] : memref<8x128xf32, #tpu.memory_space<vmem>>, vector<8x128xf32>
      tpu.vector_store %arg13[%c0_121, %c0_122], %137 {strides = array<i32>} : memref<8x128xf32, #tpu.memory_space<vmem>>, vector<8x128xf32>,
    } else {
    }
    %c3_i32 = arith.constant 3 : i32
    %c8_i32_53 = arith.constant 8 : i32
    %150 = arith.muli %c3_i32, %c8_i32_53 : i32
    %151 = tpu.assume_multiple %150, 8 : i32
    %152 = arith.index_cast %151 : i32 to index
    %c0_54 = arith.constant 0 : index
    %153 = vector.load %arg3[%152, %c0_54] : memref<64x128xf32, #tpu.memory_space<vmem>>, vector<8x128xf32>
    %154 = arith.mulf %139, %153 : vector<8x128xf32>
    %155 = arith.mulf %137, %153 : vector<8x128xf32>
    %156 = arith.index_cast %151 : i32 to index
    %c0_55 = arith.constant 0 : index
    %157 = vector.load %arg16[%156, %c0_55] : memref<64x512xf32, #tpu.memory_space<vmem>>, vector<8x512xf32>
    %cst_56 = arith.constant dense<0.000000e+00> : vector<8x512xf32>
    %158 = tpu.matmul %154, %10, %cst_56 {dimension_numbers = #tpu.dot_dimension_numbers<[1], [0], [0], [1], [0, 0, 1, 1], [], []>} : vector<8x128xf32>, vector<128x512xf32>, vector<8x512xf32> -> vector<8x512xf32>
    %159 = arith.addf %157, %158 : vector<8x512xf32>
    %160 = vector.extract_strided_slice %159 {offsets = [0, 0], sizes = [8, 128], strides = [1, 1]} : vector<8x512xf32> to vector<8x128xf32>
    %161 = arith.negf %160 : vector<8x128xf32>
    %162 = math.exp %161 : vector<8x128xf32>
    %cst_57 = arith.constant 1.000000e+00 : f32
    %163 = vector.broadcast %cst_57 : f32 to vector<8x128xf32>
    %164 = arith.addf %163, %162 : vector<8x128xf32>
    %165 = arith.divf %163, %164 : vector<8x128xf32>
    %166 = vector.extract_strided_slice %159 {offsets = [0, 128], sizes = [8, 128], strides = [1, 1]} : vector<8x512xf32> to vector<8x128xf32>
    %167 = arith.negf %166 : vector<8x128xf32>
    %168 = math.exp %167 : vector<8x128xf32>
    %cst_58 = arith.constant 1.000000e+00 : f32
    %169 = vector.broadcast %cst_58 : f32 to vector<8x128xf32>
    %170 = arith.addf %169, %168 : vector<8x128xf32>
    %171 = arith.divf %169, %170 : vector<8x128xf32>
    %172 = vector.extract_strided_slice %159 {offsets = [0, 256], sizes = [8, 128], strides = [1, 1]} : vector<8x512xf32> to vector<8x128xf32>
    %173 = math.tanh %172 : vector<8x128xf32>
    %174 = vector.extract_strided_slice %159 {offsets = [0, 384], sizes = [8, 128], strides = [1, 1]} : vector<8x512xf32> to vector<8x128xf32>
    %175 = arith.negf %174 : vector<8x128xf32>
    %176 = math.exp %175 : vector<8x128xf32>
    %cst_59 = arith.constant 1.000000e+00 : f32
    %177 = vector.broadcast %cst_59 : f32 to vector<8x128xf32>
    %178 = arith.addf %177, %176 : vector<8x128xf32>
    %179 = arith.divf %177, %178 : vector<8x128xf32>
    %180 = arith.mulf %171, %155 : vector<8x128xf32>
    %181 = arith.mulf %165, %173 : vector<8x128xf32>
    %182 = arith.addf %180, %181 : vector<8x128xf32>
    %183 = math.tanh %182 : vector<8x128xf32>
    %184 = arith.mulf %179, %183 : vector<8x128xf32>
    %cst_60 = arith.constant dense<0.000000e+00> : vector<8x128xf32>
    %185 = tpu.matmul %184, %11, %cst_60 {dimension_numbers = #tpu.dot_dimension_numbers<[1], [0], [0], [1], [0, 0, 1, 1], [], []>} : vector<8x128xf32>, vector<128x128xf32>, vector<8x128xf32> -> vector<8x128xf32>
    %186 = vector.broadcast %12 : vector<1x128xf32> to vector<8x128xf32>
    %187 = arith.addf %185, %186 : vector<8x128xf32>
    %188 = arith.index_cast %151 : i32 to index
    %c0_61 = arith.constant 0 : index
    %189 = vector.load %arg11[%188, %c0_61] : memref<64x128xf32, #tpu.memory_space<vmem>>, vector<8x128xf32>
    tpu.vector_store %arg11[%188, %c0_61], %187 {strides = array<i32>} : memref<64x128xf32, #tpu.memory_space<vmem>>, vector<8x128xf32>,
    %c8_i32_62 = arith.constant 8 : i32
    %190 = arith.muli %arg1, %c8_i32_62 : i32
    %191 = arith.addi %190, %c3_i32 : i32
    %c7_i32_63 = arith.constant 7 : i32
    %192 = arith.cmpi eq, %191, %c7_i32_63 : i32
    %193 = arith.extui %192 : i1 to i32
    %c0_i32_64 = arith.constant 0 : i32
    %194 = arith.cmpi ne, %193, %c0_i32_64 : i32
    scf.if %194 {
      %c0_119 = arith.constant 0 : index
      %c0_120 = arith.constant 0 : index
      %377 = vector.load %arg12[%c0_119, %c0_120] : memref<8x128xf32, #tpu.memory_space<vmem>>, vector<8x128xf32>
      tpu.vector_store %arg12[%c0_119, %c0_120], %184 {strides = array<i32>} : memref<8x128xf32, #tpu.memory_space<vmem>>, vector<8x128xf32>,
      %c0_121 = arith.constant 0 : index
      %c0_122 = arith.constant 0 : index
      %378 = vector.load %arg13[%c0_121, %c0_122] : memref<8x128xf32, #tpu.memory_space<vmem>>, vector<8x128xf32>
      tpu.vector_store %arg13[%c0_121, %c0_122], %182 {strides = array<i32>} : memref<8x128xf32, #tpu.memory_space<vmem>>, vector<8x128xf32>,
    } else {
    }
    %c4_i32 = arith.constant 4 : i32
    %c8_i32_65 = arith.constant 8 : i32
    %195 = arith.muli %c4_i32, %c8_i32_65 : i32
    %196 = tpu.assume_multiple %195, 8 : i32
    %197 = arith.index_cast %196 : i32 to index
    %c0_66 = arith.constant 0 : index
    %198 = vector.load %arg3[%197, %c0_66] : memref<64x128xf32, #tpu.memory_space<vmem>>, vector<8x128xf32>
    %199 = arith.mulf %184, %198 : vector<8x128xf32>
    %200 = arith.mulf %182, %198 : vector<8x128xf32>
    %201 = arith.index_cast %196 : i32 to index
    %c0_67 = arith.constant 0 : index
    %202 = vector.load %arg16[%201, %c0_67] : memref<64x512xf32, #tpu.memory_space<vmem>>, vector<8x512xf32>
    %cst_68 = arith.constant dense<0.000000e+00> : vector<8x512xf32>
    %203 = tpu.matmul %199, %10, %cst_68 {dimension_numbers = #tpu.dot_dimension_numbers<[1], [0], [0], [1], [0, 0, 1, 1], [], []>} : vector<8x128xf32>, vector<128x512xf32>, vector<8x512xf32> -> vector<8x512xf32>
    %204 = arith.addf %202, %203 : vector<8x512xf32>
    %205 = vector.extract_strided_slice %204 {offsets = [0, 0], sizes = [8, 128], strides = [1, 1]} : vector<8x512xf32> to vector<8x128xf32>
    %206 = arith.negf %205 : vector<8x128xf32>
    %207 = math.exp %206 : vector<8x128xf32>
    %cst_69 = arith.constant 1.000000e+00 : f32
    %208 = vector.broadcast %cst_69 : f32 to vector<8x128xf32>
    %209 = arith.addf %208, %207 : vector<8x128xf32>
    %210 = arith.divf %208, %209 : vector<8x128xf32>
    %211 = vector.extract_strided_slice %204 {offsets = [0, 128], sizes = [8, 128], strides = [1, 1]} : vector<8x512xf32> to vector<8x128xf32>
    %212 = arith.negf %211 : vector<8x128xf32>
    %213 = math.exp %212 : vector<8x128xf32>
    %cst_70 = arith.constant 1.000000e+00 : f32
    %214 = vector.broadcast %cst_70 : f32 to vector<8x128xf32>
    %215 = arith.addf %214, %213 : vector<8x128xf32>
    %216 = arith.divf %214, %215 : vector<8x128xf32>
    %217 = vector.extract_strided_slice %204 {offsets = [0, 256], sizes = [8, 128], strides = [1, 1]} : vector<8x512xf32> to vector<8x128xf32>
    %218 = math.tanh %217 : vector<8x128xf32>
    %219 = vector.extract_strided_slice %204 {offsets = [0, 384], sizes = [8, 128], strides = [1, 1]} : vector<8x512xf32> to vector<8x128xf32>
    %220 = arith.negf %219 : vector<8x128xf32>
    %221 = math.exp %220 : vector<8x128xf32>
    %cst_71 = arith.constant 1.000000e+00 : f32
    %222 = vector.broadcast %cst_71 : f32 to vector<8x128xf32>
    %223 = arith.addf %222, %221 : vector<8x128xf32>
    %224 = arith.divf %222, %223 : vector<8x128xf32>
    %225 = arith.mulf %216, %200 : vector<8x128xf32>
    %226 = arith.mulf %210, %218 : vector<8x128xf32>
    %227 = arith.addf %225, %226 : vector<8x128xf32>
    %228 = math.tanh %227 : vector<8x128xf32>
    %229 = arith.mulf %224, %228 : vector<8x128xf32>
    %cst_72 = arith.constant dense<0.000000e+00> : vector<8x128xf32>
    %230 = tpu.matmul %229, %11, %cst_72 {dimension_numbers = #tpu.dot_dimension_numbers<[1], [0], [0], [1], [0, 0, 1, 1], [], []>} : vector<8x128xf32>, vector<128x128xf32>, vector<8x128xf32> -> vector<8x128xf32>
    %231 = vector.broadcast %12 : vector<1x128xf32> to vector<8x128xf32>
    %232 = arith.addf %230, %231 : vector<8x128xf32>
    %233 = arith.index_cast %196 : i32 to index
    %c0_73 = arith.constant 0 : index
    %234 = vector.load %arg11[%233, %c0_73] : memref<64x128xf32, #tpu.memory_space<vmem>>, vector<8x128xf32>
    tpu.vector_store %arg11[%233, %c0_73], %232 {strides = array<i32>} : memref<64x128xf32, #tpu.memory_space<vmem>>, vector<8x128xf32>,
    %c8_i32_74 = arith.constant 8 : i32
    %235 = arith.muli %arg1, %c8_i32_74 : i32
    %236 = arith.addi %235, %c4_i32 : i32
    %c7_i32_75 = arith.constant 7 : i32
    %237 = arith.cmpi eq, %236, %c7_i32_75 : i32
    %238 = arith.extui %237 : i1 to i32
    %c0_i32_76 = arith.constant 0 : i32
    %239 = arith.cmpi ne, %238, %c0_i32_76 : i32
    scf.if %239 {
      %c0_119 = arith.constant 0 : index
      %c0_120 = arith.constant 0 : index
      %377 = vector.load %arg12[%c0_119, %c0_120] : memref<8x128xf32, #tpu.memory_space<vmem>>, vector<8x128xf32>
      tpu.vector_store %arg12[%c0_119, %c0_120], %229 {strides = array<i32>} : memref<8x128xf32, #tpu.memory_space<vmem>>, vector<8x128xf32>,
      %c0_121 = arith.constant 0 : index
      %c0_122 = arith.constant 0 : index
      %378 = vector.load %arg13[%c0_121, %c0_122] : memref<8x128xf32, #tpu.memory_space<vmem>>, vector<8x128xf32>
      tpu.vector_store %arg13[%c0_121, %c0_122], %227 {strides = array<i32>} : memref<8x128xf32, #tpu.memory_space<vmem>>, vector<8x128xf32>,
    } else {
    }
    %c5_i32 = arith.constant 5 : i32
    %c8_i32_77 = arith.constant 8 : i32
    %240 = arith.muli %c5_i32, %c8_i32_77 : i32
    %241 = tpu.assume_multiple %240, 8 : i32
    %242 = arith.index_cast %241 : i32 to index
    %c0_78 = arith.constant 0 : index
    %243 = vector.load %arg3[%242, %c0_78] : memref<64x128xf32, #tpu.memory_space<vmem>>, vector<8x128xf32>
    %244 = arith.mulf %229, %243 : vector<8x128xf32>
    %245 = arith.mulf %227, %243 : vector<8x128xf32>
    %246 = arith.index_cast %241 : i32 to index
    %c0_79 = arith.constant 0 : index
    %247 = vector.load %arg16[%246, %c0_79] : memref<64x512xf32, #tpu.memory_space<vmem>>, vector<8x512xf32>
    %cst_80 = arith.constant dense<0.000000e+00> : vector<8x512xf32>
    %248 = tpu.matmul %244, %10, %cst_80 {dimension_numbers = #tpu.dot_dimension_numbers<[1], [0], [0], [1], [0, 0, 1, 1], [], []>} : vector<8x128xf32>, vector<128x512xf32>, vector<8x512xf32> -> vector<8x512xf32>
    %249 = arith.addf %247, %248 : vector<8x512xf32>
    %250 = vector.extract_strided_slice %249 {offsets = [0, 0], sizes = [8, 128], strides = [1, 1]} : vector<8x512xf32> to vector<8x128xf32>
    %251 = arith.negf %250 : vector<8x128xf32>
    %252 = math.exp %251 : vector<8x128xf32>
    %cst_81 = arith.constant 1.000000e+00 : f32
    %253 = vector.broadcast %cst_81 : f32 to vector<8x128xf32>
    %254 = arith.addf %253, %252 : vector<8x128xf32>
    %255 = arith.divf %253, %254 : vector<8x128xf32>
    %256 = vector.extract_strided_slice %249 {offsets = [0, 128], sizes = [8, 128], strides = [1, 1]} : vector<8x512xf32> to vector<8x128xf32>
    %257 = arith.negf %256 : vector<8x128xf32>
    %258 = math.exp %257 : vector<8x128xf32>
    %cst_82 = arith.constant 1.000000e+00 : f32
    %259 = vector.broadcast %cst_82 : f32 to vector<8x128xf32>
    %260 = arith.addf %259, %258 : vector<8x128xf32>
    %261 = arith.divf %259, %260 : vector<8x128xf32>
    %262 = vector.extract_strided_slice %249 {offsets = [0, 256], sizes = [8, 128], strides = [1, 1]} : vector<8x512xf32> to vector<8x128xf32>
    %263 = math.tanh %262 : vector<8x128xf32>
    %264 = vector.extract_strided_slice %249 {offsets = [0, 384], sizes = [8, 128], strides = [1, 1]} : vector<8x512xf32> to vector<8x128xf32>
    %265 = arith.negf %264 : vector<8x128xf32>
    %266 = math.exp %265 : vector<8x128xf32>
    %cst_83 = arith.constant 1.000000e+00 : f32
    %267 = vector.broadcast %cst_83 : f32 to vector<8x128xf32>
    %268 = arith.addf %267, %266 : vector<8x128xf32>
    %269 = arith.divf %267, %268 : vector<8x128xf32>
    %270 = arith.mulf %261, %245 : vector<8x128xf32>
    %271 = arith.mulf %255, %263 : vector<8x128xf32>
    %272 = arith.addf %270, %271 : vector<8x128xf32>
    %273 = math.tanh %272 : vector<8x128xf32>
    %274 = arith.mulf %269, %273 : vector<8x128xf32>
    %cst_84 = arith.constant dense<0.000000e+00> : vector<8x128xf32>
    %275 = tpu.matmul %274, %11, %cst_84 {dimension_numbers = #tpu.dot_dimension_numbers<[1], [0], [0], [1], [0, 0, 1, 1], [], []>} : vector<8x128xf32>, vector<128x128xf32>, vector<8x128xf32> -> vector<8x128xf32>
    %276 = vector.broadcast %12 : vector<1x128xf32> to vector<8x128xf32>
    %277 = arith.addf %275, %276 : vector<8x128xf32>
    %278 = arith.index_cast %241 : i32 to index
    %c0_85 = arith.constant 0 : index
    %279 = vector.load %arg11[%278, %c0_85] : memref<64x128xf32, #tpu.memory_space<vmem>>, vector<8x128xf32>
    tpu.vector_store %arg11[%278, %c0_85], %277 {strides = array<i32>} : memref<64x128xf32, #tpu.memory_space<vmem>>, vector<8x128xf32>,
    %c8_i32_86 = arith.constant 8 : i32
    %280 = arith.muli %arg1, %c8_i32_86 : i32
    %281 = arith.addi %280, %c5_i32 : i32
    %c7_i32_87 = arith.constant 7 : i32
    %282 = arith.cmpi eq, %281, %c7_i32_87 : i32
    %283 = arith.extui %282 : i1 to i32
    %c0_i32_88 = arith.constant 0 : i32
    %284 = arith.cmpi ne, %283, %c0_i32_88 : i32
    scf.if %284 {
      %c0_119 = arith.constant 0 : index
      %c0_120 = arith.constant 0 : index
      %377 = vector.load %arg12[%c0_119, %c0_120] : memref<8x128xf32, #tpu.memory_space<vmem>>, vector<8x128xf32>
      tpu.vector_store %arg12[%c0_119, %c0_120], %274 {strides = array<i32>} : memref<8x128xf32, #tpu.memory_space<vmem>>, vector<8x128xf32>,
      %c0_121 = arith.constant 0 : index
      %c0_122 = arith.constant 0 : index
      %378 = vector.load %arg13[%c0_121, %c0_122] : memref<8x128xf32, #tpu.memory_space<vmem>>, vector<8x128xf32>
      tpu.vector_store %arg13[%c0_121, %c0_122], %272 {strides = array<i32>} : memref<8x128xf32, #tpu.memory_space<vmem>>, vector<8x128xf32>,
    } else {
    }
    %c6_i32 = arith.constant 6 : i32
    %c8_i32_89 = arith.constant 8 : i32
    %285 = arith.muli %c6_i32, %c8_i32_89 : i32
    %286 = tpu.assume_multiple %285, 8 : i32
    %287 = arith.index_cast %286 : i32 to index
    %c0_90 = arith.constant 0 : index
    %288 = vector.load %arg3[%287, %c0_90] : memref<64x128xf32, #tpu.memory_space<vmem>>, vector<8x128xf32>
    %289 = arith.mulf %274, %288 : vector<8x128xf32>
    %290 = arith.mulf %272, %288 : vector<8x128xf32>
    %291 = arith.index_cast %286 : i32 to index
    %c0_91 = arith.constant 0 : index
    %292 = vector.load %arg16[%291, %c0_91] : memref<64x512xf32, #tpu.memory_space<vmem>>, vector<8x512xf32>
    %cst_92 = arith.constant dense<0.000000e+00> : vector<8x512xf32>
    %293 = tpu.matmul %289, %10, %cst_92 {dimension_numbers = #tpu.dot_dimension_numbers<[1], [0], [0], [1], [0, 0, 1, 1], [], []>} : vector<8x128xf32>, vector<128x512xf32>, vector<8x512xf32> -> vector<8x512xf32>
    %294 = arith.addf %292, %293 : vector<8x512xf32>
    %295 = vector.extract_strided_slice %294 {offsets = [0, 0], sizes = [8, 128], strides = [1, 1]} : vector<8x512xf32> to vector<8x128xf32>
    %296 = arith.negf %295 : vector<8x128xf32>
    %297 = math.exp %296 : vector<8x128xf32>
    %cst_93 = arith.constant 1.000000e+00 : f32
    %298 = vector.broadcast %cst_93 : f32 to vector<8x128xf32>
    %299 = arith.addf %298, %297 : vector<8x128xf32>
    %300 = arith.divf %298, %299 : vector<8x128xf32>
    %301 = vector.extract_strided_slice %294 {offsets = [0, 128], sizes = [8, 128], strides = [1, 1]} : vector<8x512xf32> to vector<8x128xf32>
    %302 = arith.negf %301 : vector<8x128xf32>
    %303 = math.exp %302 : vector<8x128xf32>
    %cst_94 = arith.constant 1.000000e+00 : f32
    %304 = vector.broadcast %cst_94 : f32 to vector<8x128xf32>
    %305 = arith.addf %304, %303 : vector<8x128xf32>
    %306 = arith.divf %304, %305 : vector<8x128xf32>
    %307 = vector.extract_strided_slice %294 {offsets = [0, 256], sizes = [8, 128], strides = [1, 1]} : vector<8x512xf32> to vector<8x128xf32>
    %308 = math.tanh %307 : vector<8x128xf32>
    %309 = vector.extract_strided_slice %294 {offsets = [0, 384], sizes = [8, 128], strides = [1, 1]} : vector<8x512xf32> to vector<8x128xf32>
    %310 = arith.negf %309 : vector<8x128xf32>
    %311 = math.exp %310 : vector<8x128xf32>
    %cst_95 = arith.constant 1.000000e+00 : f32
    %312 = vector.broadcast %cst_95 : f32 to vector<8x128xf32>
    %313 = arith.addf %312, %311 : vector<8x128xf32>
    %314 = arith.divf %312, %313 : vector<8x128xf32>
    %315 = arith.mulf %306, %290 : vector<8x128xf32>
    %316 = arith.mulf %300, %308 : vector<8x128xf32>
    %317 = arith.addf %315, %316 : vector<8x128xf32>
    %318 = math.tanh %317 : vector<8x128xf32>
    %319 = arith.mulf %314, %318 : vector<8x128xf32>
    %cst_96 = arith.constant dense<0.000000e+00> : vector<8x128xf32>
    %320 = tpu.matmul %319, %11, %cst_96 {dimension_numbers = #tpu.dot_dimension_numbers<[1], [0], [0], [1], [0, 0, 1, 1], [], []>} : vector<8x128xf32>, vector<128x128xf32>, vector<8x128xf32> -> vector<8x128xf32>
    %321 = vector.broadcast %12 : vector<1x128xf32> to vector<8x128xf32>
    %322 = arith.addf %320, %321 : vector<8x128xf32>
    %323 = arith.index_cast %286 : i32 to index
    %c0_97 = arith.constant 0 : index
    %324 = vector.load %arg11[%323, %c0_97] : memref<64x128xf32, #tpu.memory_space<vmem>>, vector<8x128xf32>
    tpu.vector_store %arg11[%323, %c0_97], %322 {strides = array<i32>} : memref<64x128xf32, #tpu.memory_space<vmem>>, vector<8x128xf32>,
    %c8_i32_98 = arith.constant 8 : i32
    %325 = arith.muli %arg1, %c8_i32_98 : i32
    %326 = arith.addi %325, %c6_i32 : i32
    %c7_i32_99 = arith.constant 7 : i32
    %327 = arith.cmpi eq, %326, %c7_i32_99 : i32
    %328 = arith.extui %327 : i1 to i32
    %c0_i32_100 = arith.constant 0 : i32
    %329 = arith.cmpi ne, %328, %c0_i32_100 : i32
    scf.if %329 {
      %c0_119 = arith.constant 0 : index
      %c0_120 = arith.constant 0 : index
      %377 = vector.load %arg12[%c0_119, %c0_120] : memref<8x128xf32, #tpu.memory_space<vmem>>, vector<8x128xf32>
      tpu.vector_store %arg12[%c0_119, %c0_120], %319 {strides = array<i32>} : memref<8x128xf32, #tpu.memory_space<vmem>>, vector<8x128xf32>,
      %c0_121 = arith.constant 0 : index
      %c0_122 = arith.constant 0 : index
      %378 = vector.load %arg13[%c0_121, %c0_122] : memref<8x128xf32, #tpu.memory_space<vmem>>, vector<8x128xf32>
      tpu.vector_store %arg13[%c0_121, %c0_122], %317 {strides = array<i32>} : memref<8x128xf32, #tpu.memory_space<vmem>>, vector<8x128xf32>,
    } else {
    }
    %c7_i32_101 = arith.constant 7 : i32
    %c8_i32_102 = arith.constant 8 : i32
    %330 = arith.muli %c7_i32_101, %c8_i32_102 : i32
    %331 = tpu.assume_multiple %330, 8 : i32
    %332 = arith.index_cast %331 : i32 to index
    %c0_103 = arith.constant 0 : index
    %333 = vector.load %arg3[%332, %c0_103] : memref<64x128xf32, #tpu.memory_space<vmem>>, vector<8x128xf32>
    %334 = arith.mulf %319, %333 : vector<8x128xf32>
    %335 = arith.mulf %317, %333 : vector<8x128xf32>
    %336 = arith.index_cast %331 : i32 to index
    %c0_104 = arith.constant 0 : index
    %337 = vector.load %arg16[%336, %c0_104] : memref<64x512xf32, #tpu.memory_space<vmem>>, vector<8x512xf32>
    %cst_105 = arith.constant dense<0.000000e+00> : vector<8x512xf32>
    %338 = tpu.matmul %334, %10, %cst_105 {dimension_numbers = #tpu.dot_dimension_numbers<[1], [0], [0], [1], [0, 0, 1, 1], [], []>} : vector<8x128xf32>, vector<128x512xf32>, vector<8x512xf32> -> vector<8x512xf32>
    %339 = arith.addf %337, %338 : vector<8x512xf32>
    %340 = vector.extract_strided_slice %339 {offsets = [0, 0], sizes = [8, 128], strides = [1, 1]} : vector<8x512xf32> to vector<8x128xf32>
    %341 = arith.negf %340 : vector<8x128xf32>
    %342 = math.exp %341 : vector<8x128xf32>
    %cst_106 = arith.constant 1.000000e+00 : f32
    %343 = vector.broadcast %cst_106 : f32 to vector<8x128xf32>
    %344 = arith.addf %343, %342 : vector<8x128xf32>
    %345 = arith.divf %343, %344 : vector<8x128xf32>
    %346 = vector.extract_strided_slice %339 {offsets = [0, 128], sizes = [8, 128], strides = [1, 1]} : vector<8x512xf32> to vector<8x128xf32>
    %347 = arith.negf %346 : vector<8x128xf32>
    %348 = math.exp %347 : vector<8x128xf32>
    %cst_107 = arith.constant 1.000000e+00 : f32
    %349 = vector.broadcast %cst_107 : f32 to vector<8x128xf32>
    %350 = arith.addf %349, %348 : vector<8x128xf32>
    %351 = arith.divf %349, %350 : vector<8x128xf32>
    %352 = vector.extract_strided_slice %339 {offsets = [0, 256], sizes = [8, 128], strides = [1, 1]} : vector<8x512xf32> to vector<8x128xf32>
    %353 = math.tanh %352 : vector<8x128xf32>
    %354 = vector.extract_strided_slice %339 {offsets = [0, 384], sizes = [8, 128], strides = [1, 1]} : vector<8x512xf32> to vector<8x128xf32>
    %355 = arith.negf %354 : vector<8x128xf32>
    %356 = math.exp %355 : vector<8x128xf32>
    %cst_108 = arith.constant 1.000000e+00 : f32
    %357 = vector.broadcast %cst_108 : f32 to vector<8x128xf32>
    %358 = arith.addf %357, %356 : vector<8x128xf32>
    %359 = arith.divf %357, %358 : vector<8x128xf32>
    %360 = arith.mulf %351, %335 : vector<8x128xf32>
    %361 = arith.mulf %345, %353 : vector<8x128xf32>
    %362 = arith.addf %360, %361 : vector<8x128xf32>
    %363 = math.tanh %362 : vector<8x128xf32>
    %364 = arith.mulf %359, %363 : vector<8x128xf32>
    %cst_109 = arith.constant dense<0.000000e+00> : vector<8x128xf32>
    %365 = tpu.matmul %364, %11, %cst_109 {dimension_numbers = #tpu.dot_dimension_numbers<[1], [0], [0], [1], [0, 0, 1, 1], [], []>} : vector<8x128xf32>, vector<128x128xf32>, vector<8x128xf32> -> vector<8x128xf32>
    %366 = vector.broadcast %12 : vector<1x128xf32> to vector<8x128xf32>
    %367 = arith.addf %365, %366 : vector<8x128xf32>
    %368 = arith.index_cast %331 : i32 to index
    %c0_110 = arith.constant 0 : index
    %369 = vector.load %arg11[%368, %c0_110] : memref<64x128xf32, #tpu.memory_space<vmem>>, vector<8x128xf32>
    tpu.vector_store %arg11[%368, %c0_110], %367 {strides = array<i32>} : memref<64x128xf32, #tpu.memory_space<vmem>>, vector<8x128xf32>,
    %c8_i32_111 = arith.constant 8 : i32
    %370 = arith.muli %arg1, %c8_i32_111 : i32
    %371 = arith.addi %370, %c7_i32_101 : i32
    %c7_i32_112 = arith.constant 7 : i32
    %372 = arith.cmpi eq, %371, %c7_i32_112 : i32
    %373 = arith.extui %372 : i1 to i32
    %c0_i32_113 = arith.constant 0 : i32
    %374 = arith.cmpi ne, %373, %c0_i32_113 : i32
    scf.if %374 {
      %c0_119 = arith.constant 0 : index
      %c0_120 = arith.constant 0 : index
      %377 = vector.load %arg12[%c0_119, %c0_120] : memref<8x128xf32, #tpu.memory_space<vmem>>, vector<8x128xf32>
      tpu.vector_store %arg12[%c0_119, %c0_120], %364 {strides = array<i32>} : memref<8x128xf32, #tpu.memory_space<vmem>>, vector<8x128xf32>,
      %c0_121 = arith.constant 0 : index
      %c0_122 = arith.constant 0 : index
      %378 = vector.load %arg13[%c0_121, %c0_122] : memref<8x128xf32, #tpu.memory_space<vmem>>, vector<8x128xf32>
      tpu.vector_store %arg13[%c0_121, %c0_122], %362 {strides = array<i32>} : memref<8x128xf32, #tpu.memory_space<vmem>>, vector<8x128xf32>,
    } else {
    }
    %c8_i32_114 = arith.constant 8 : i32
    %c0_115 = arith.constant 0 : index
    %c0_116 = arith.constant 0 : index
    %375 = vector.load %arg14[%c0_115, %c0_116] : memref<8x128xf32, #tpu.memory_space<vmem>>, vector<8x128xf32>
    tpu.vector_store %arg14[%c0_115, %c0_116], %364 {strides = array<i32>} : memref<8x128xf32, #tpu.memory_space<vmem>>, vector<8x128xf32>,
    %c0_117 = arith.constant 0 : index
    %c0_118 = arith.constant 0 : index
    %376 = vector.load %arg15[%c0_117, %c0_118] : memref<8x128xf32, #tpu.memory_space<vmem>>, vector<8x128xf32>
    tpu.vector_store %arg15[%c0_117, %c0_118], %362 {strides = array<i32>} : memref<8x128xf32, #tpu.memory_space<vmem>>, vector<8x128xf32>,
    return
  }
  func.func @transform_0(%arg0: i32, %arg1: i32) -> (i32, i32) {
    %c1_i32 = arith.constant 1 : i32
    %0 = arith.muli %arg1, %c1_i32 : i32
    %1 = arith.addi %0, %arg0 : i32
    %c0_i32 = arith.constant 0 : i32
    %c0_i32_0 = arith.constant 0 : i32
    return %1, %c0_i32 : i32, i32
  }
  func.func @transform_1(%arg0: i32, %arg1: i32) -> (i32, i32) {
    %c1_i32 = arith.constant 1 : i32
    %0 = arith.muli %arg1, %c1_i32 : i32
    %1 = arith.addi %0, %arg0 : i32
    %c0_i32 = arith.constant 0 : i32
    %c0_i32_0 = arith.constant 0 : i32
    return %1, %c0_i32 : i32, i32
  }
  func.func @transform_2(%arg0: i32, %arg1: i32) -> (i32, i32) {
    %c0_i32 = arith.constant 0 : i32
    %c0_i32_0 = arith.constant 0 : i32
    return %arg0, %c0_i32 : i32, i32
  }
  func.func @transform_3(%arg0: i32, %arg1: i32) -> (i32, i32) {
    %c0_i32 = arith.constant 0 : i32
    %c0_i32_0 = arith.constant 0 : i32
    return %arg0, %c0_i32 : i32, i32
  }
  func.func @transform_4(%arg0: i32, %arg1: i32) -> (i32, i32) {
    %c0_i32 = arith.constant 0 : i32
    %c0_i32_0 = arith.constant 0 : i32
    %c0_i32_1 = arith.constant 0 : i32
    return %c0_i32, %c0_i32_0 : i32, i32
  }
  func.func @transform_5(%arg0: i32, %arg1: i32) -> (i32, i32) {
    %c0_i32 = arith.constant 0 : i32
    %c0_i32_0 = arith.constant 0 : i32
    %c0_i32_1 = arith.constant 0 : i32
    return %c0_i32, %c0_i32_0 : i32, i32
  }
  func.func @transform_6(%arg0: i32, %arg1: i32) -> (i32, i32) {
    %c0_i32 = arith.constant 0 : i32
    %c0_i32_0 = arith.constant 0 : i32
    %c0_i32_1 = arith.constant 0 : i32
    return %c0_i32, %c0_i32_0 : i32, i32
  }
  func.func @transform_7(%arg0: i32, %arg1: i32) -> (i32, i32) {
    %c0_i32 = arith.constant 0 : i32
    %c0_i32_0 = arith.constant 0 : i32
    %c0_i32_1 = arith.constant 0 : i32
    return %c0_i32, %c0_i32_0 : i32, i32
  }
  func.func @transform_8(%arg0: i32, %arg1: i32) -> (i32, i32) {
    %c0_i32 = arith.constant 0 : i32
    %c0_i32_0 = arith.constant 0 : i32
    %c0_i32_1 = arith.constant 0 : i32
    return %c0_i32, %c0_i32_0 : i32, i32
  }
  func.func @transform_9(%arg0: i32, %arg1: i32) -> (i32, i32) {
    %c1_i32 = arith.constant 1 : i32
    %0 = arith.muli %arg1, %c1_i32 : i32
    %1 = arith.addi %0, %arg0 : i32
    %c0_i32 = arith.constant 0 : i32
    %c0_i32_0 = arith.constant 0 : i32
    return %1, %c0_i32 : i32, i32
  }
  func.func @transform_10(%arg0: i32, %arg1: i32) -> (i32, i32) {
    %c0_i32 = arith.constant 0 : i32
    %c0_i32_0 = arith.constant 0 : i32
    return %arg0, %c0_i32 : i32, i32
  }
  func.func @transform_11(%arg0: i32, %arg1: i32) -> (i32, i32) {
    %c0_i32 = arith.constant 0 : i32
    %c0_i32_0 = arith.constant 0 : i32
    return %arg0, %c0_i32 : i32, i32
  }
}

</mosaic_0001>

<bundles_post_ra>
// kernel: forward.1
= control target key start
LH: loop header
LB: loop body
LE: loop exit
PB: predicated region body
PF: predicated region fallthrough
CT: control target
= control target key end

     0   :  { %17 = vsyncpa [#allocation6], 0  ;;  %s4065_s17 = smov [#allocation5]   ;;  %s4909_s0 = inlined_call_operand.vmem [shape: f32[64,16], index: 0, kind: input, shape index: {}]   ;;  %s4910_s1 = inlined_call_operand.vmem [shape: f32[64,128], index: 1, kind: input, shape index: {}]   ;;  %s4911_s2 = inlined_call_operand.vmem [shape: f32[8,128], index: 2, kind: input, shape index: {}]   ;;  %s4912_s3 = inlined_call_operand.vmem [shape: f32[8,128], index: 3, kind: input, shape index: {}]   ;;  %s4913_s4 = inlined_call_operand.vmem [shape: f32[16,512], index: 4, kind: input, shape index: {}]   ;;  %s4914_s5 = inlined_call_operand.hbm [shape: f32[128,512], index: 5, kind: input, shape index: {}]   ;;  %s4915_s6 = inlined_call_operand.vmem [shape: f32[1,512], index: 6, kind: input, shape index: {}]   ;;  %s4916_s7 = inlined_call_operand.vmem [shape: f32[128,128], index: 7, kind: input, shape index: {}]   ;;  %s4917_s8 = inlined_call_operand.vmem [shape: f32[1,128], index: 8, kind: input, shape index: {}]   ;;  %s4918_s9 = inlined_call_operand.vmem [shape: f32[64,128], index: 9, kind: output, shape index: {0}]   ;;  %s4919_s10 = inlined_call_operand.vmem [shape: f32[8,128], index: 10, kind: output, shape index: {1}]   ;;  %s4920_s11 = inlined_call_operand.vmem [shape: f32[8,128], index: 11, kind: output, shape index: {2}]  }
   0x1   :  { %s49_s18 = sshll.u32 %s4065_s17, 4  ;;  %s4041_s21 = scalar_lea.hbm %s4914_s5, 8192  ;;  %s50_s18 = int_to_ptr.vmem [resolvable:$true] %s49_s18 }
   0x2   :  { %p4042_p0 = scmp.ne.s32.totalorder %s4914_s5, %s4041_s21  ;;  %p4045_p1 = scmp.lt.u32.totalorder %s4041_s21, %s4914_s5 }
   0x4   :  { %p4047_p2 = pnand %p4045_p1, %p4042_p0 }
   0x6   :  { %4050 = shalt.err (!%p4047_p2)
}
   0x7   :  { %s4051_s26 = scalar_lea.vmem %s50_s18, 8192  ;;  %p4056_p4 = scmp.lt.s32.totalorder %s50_s18, %s50_s18 }
   0x8   :  { %p4052_p3 = scmp.ne.s32.totalorder %s50_s18, %s4051_s26  ;;  %p4057_p5 = scmp.lt.s32.totalorder %s4051_s26, %s4051_s26 }
   0xa   :  { %p4058_p6 = por %p4057_p5, %p4056_p4 }
   0xc   :  { %p4059_p7 = pnand %p4058_p6, %p4052_p3 }
   0xe   :  { %4062 = shalt.err (!%p4059_p7)
}
   0xf   :  { %s4066_s27 = smov 512   ;;  %s4067_s28 = smov 32  }
  0x10   :  { %55 = dma.hbm_to_vmem [thread:$0]  %s4914_s5, 8192, %s50_s18, [#allocation6], %s4066_s27, %s4066_s27, %s4067_s28  }
  0x11   :  { %4063 = dma.done.wait [#allocation6], 8192  }
  0x12   :  { %4064 = vsyncadd [#allocation6], 4294959104  ;;  %v4068_v0 = vmov 0.0   ;;  %v124_v1 = vld [vmem:[%s4913_s4 + $0x8] sm:$0xff]  ;;  %v126_v3 = vld [vmem:[%s4913_s4 + $0x18] sm:$0xff]  ;;  %vm153_vm0 = vcmask 130048  }
  0x13   :  { %242 = vmatprep.mubr.f32.mxu0 %v4068_v0  ;;  %355 = vmatprep.mubr.f32.mxu1 %v4068_v0  ;;  %v128_v2 = vld [vmem:[%s4913_s4 + $0x28] sm:$0xff]  ;;  %v130_v5 = vld [vmem:[%s4913_s4 + $0x38] sm:$0xff]  ;;  %v123_v6 = vld [vmem:[%s4913_s4] sm:$0xff]  ;;  %vm4070_vm1 = vmmov 0  }
  0x14   :  { %v3130_v4 = vpack.c.bf16 %v128_v2, %v124_v1  ;;  %v127_v7 = vld [vmem:[%s4913_s4 + $0x20] sm:$0xff]  ;;  %v3134_v8 = vpack.c.bf16 %v130_v5, %v126_v3  ;;  %v125_v10 = vld [vmem:[%s4913_s4 + $0x10] sm:$0xff]  ;;  %v437_v14 = vld [vmem:[#allocation5 + $0x8] sm:$0xff] }
  0x15   :  { %v3132_v9 = vpack.c.bf16 %v127_v7, %v123_v6  ;;  %v129_v11 = vld [vmem:[%s4913_s4 + $0x30] sm:$0xff]  ;;  %v115_v12 = vld [vmem:[%s4909_s0] sm:$0xff]  ;;  %v441_v15 = vld [vmem:[#allocation5 + $0x28] sm:$0xff] }
  0x16   :  { %3131 = vmatprep.subr.bf16.mxu0 %v3130_v4  ;;  %v3136_v13 = vpack.c.bf16 %v129_v11, %v125_v10  ;;  %v439_v16 = vld [vmem:[#allocation5 + $0x18] sm:$0xff]  ;;  %3135 = vmatprep.subr.bf16.mxu1 %v3134_v8  ;;  %v4172_v17 = vpack.c.bf16 %v441_v15, %v437_v14  ;;  %v436_v19 = vld [vmem:[#allocation5] sm:$0xff]  ;;  %v438_v23 = vld [vmem:[#allocation5 + $0x10] sm:$0xff] }
  0x17   :  { %3133 = vmatpush1.bf16.msra.mxu0 %v3132_v9  ;;  %v443_v18 = vld [vmem:[#allocation5 + $0x38] sm:$0xff]  ;;  %v440_v20 = vld [vmem:[#allocation5 + $0x20] sm:$0xff]  ;;  %v442_v24 = vld [vmem:[#allocation5 + $0x30] sm:$0xff] }
  0x18   :  { %3137 = vmatpush1.bf16.msra.mxu1 %v3136_v13  ;;  %v4174_v21 = vpack.c.bf16 %v443_v18, %v439_v16  ;;  %v4176_v22 = vpack.c.bf16 %v440_v20, %v436_v19  ;;  %3139 = vmatprep.subr.bf16.mxu0 %v4172_v17  ;;  %v4179_v25 = vpack.c.bf16 %v442_v24, %v438_v23  ;;  %v445_v26 = vld [vmem:[#allocation5 + $0x48] sm:$0xff]  ;;  %v447_v28 = vld [vmem:[#allocation5 + $0x58] sm:$0xff]  ;;  %v444_v31 = vld [vmem:[#allocation5 + $0x40] sm:$0xff] }
  0x19   :  { %v449_v27 = vld [vmem:[#allocation5 + $0x68] sm:$0xff]  ;;  %v451_v30 = vld [vmem:[#allocation5 + $0x78] sm:$0xff]  ;;  %v448_v32 = vld [vmem:[#allocation5 + $0x60] sm:$0xff] }
  0x1a   :  { %2659 = vmatmul.mubr.msk.f32.vlgmr.msra.gmra.mrb[0].mxu0 %vm153_vm0, %v115_v12  ;;  %3171 = vmatprep.subr.bf16.mxu1 %v4174_v21  ;;  %v4183_v29 = vpack.c.bf16 %v449_v27, %v445_v26  ;;  %v116_v33 = vld [vmem:[%s4909_s0 + $0x8] sm:$0xff]  ;;  %v4190_v34 = vpack.c.bf16 %v451_v30, %v447_v28  ;;  %v4192_v35 = vpack.c.bf16 %v448_v32, %v444_v31  ;;  %v446_v36 = vld [vmem:[#allocation5 + $0x50] sm:$0xff]  ;;  %v455_v41 = vld [vmem:[#allocation5 + $0x98] sm:$0xff] }
  0x1b   :  { %2667 = vmatmul.mubr.msk.f32.vlgmr.msra.gmra.mrb[0].mxu1 %vm153_vm0, %v115_v12  ;;  %3141 = vmatpush1.bf16.msra.mxu0 %v4176_v22  ;;  %v450_v37 = vld [vmem:[#allocation5 + $0x70] sm:$0xff]  ;;  %v453_v39 = vld [vmem:[#allocation5 + $0x88] sm:$0xff]  ;;  %v459_v43 = vld [vmem:[#allocation5 + $0xb8] sm:$0xff] }
  0x1c   :  { %3173 = vmatpush1.bf16.msra.mxu1 %v4179_v25  ;;  %248 = vmatprep.mubr.f32.mxu0 %v4068_v0  ;;  %v4196_v38 = vpack.c.bf16 %v450_v37, %v446_v36  ;;  %v457_v40 = vld [vmem:[#allocation5 + $0xa8] sm:$0xff]  ;;  %v452_v44 = vld [vmem:[#allocation5 + $0x80] sm:$0xff]  ;;  %v117_v46 = vld [vmem:[%s4909_s0 + $0x10] sm:$0xff]  ;;  %v4207_v47 = vpack.c.bf16 %v459_v43, %v455_v41 }
  0x1d   :  { %361 = vmatprep.mubr.f32.mxu1 %v4068_v0  ;;  %3143 = vmatprep.subr.bf16.mxu0 %v4183_v29  ;;  %v4200_v42 = vpack.c.bf16 %v457_v40, %v453_v39  ;;  %v456_v45 = vld [vmem:[#allocation5 + $0xa0] sm:$0xff]  ;;  %v454_v48 = vld [vmem:[#allocation5 + $0x90] sm:$0xff]  ;;  %v461_v51 = vld [vmem:[#allocation5 + $0xc8] sm:$0xff] }
  0x1e   :  { %2660 = vmatmul.mubr.msk.f32.gmra.mrb[2].mxu0 %vm153_vm0, %v116_v33  ;;  %3175 = vmatprep.subr.bf16.mxu1 %v4190_v34  ;;  %v458_v49 = vld [vmem:[#allocation5 + $0xb0] sm:$0xff]  ;;  %v4211_v50 = vpack.c.bf16 %v456_v45, %v452_v44  ;;  %v465_v52 = vld [vmem:[#allocation5 + $0xe8] sm:$0xff]  ;;  %v463_v53 = vld [vmem:[#allocation5 + $0xd8] sm:$0xff] }
  0x1f   :  { %2668 = vmatmul.mubr.msk.f32.gmra.mrb[2].mxu1 %vm153_vm0, %v116_v33  ;;  %3145 = vmatpush1.bf16.msra.mxu0 %v4192_v35  ;;  %v4215_v54 = vpack.c.bf16 %v458_v49, %v454_v48  ;;  %v467_v55 = vld [vmem:[#allocation5 + $0xf8] sm:$0xff]  ;;  %v460_v56 = vld [vmem:[#allocation5 + $0xc0] sm:$0xff]  ;;  %v4219_v58 = vpack.c.bf16 %v465_v52, %v461_v51  ;;  %v462_v59 = vld [vmem:[#allocation5 + $0xd0] sm:$0xff] }
  0x20   :  { %3177 = vmatpush1.bf16.msra.mxu1 %v4196_v38  ;;  %254 = vmatprep.mubr.f32.mxu0 %v4068_v0  ;;  %v464_v57 = vld [vmem:[#allocation5 + $0xe0] sm:$0xff]  ;;  %v466_v60 = vld [vmem:[#allocation5 + $0xf0] sm:$0xff]  ;;  %v4223_v61 = vpack.c.bf16 %v467_v55, %v463_v53  ;;  %v469_v62 = vld [vmem:[#allocation5 + $0x108] sm:$0xff] }
  0x21   :  { %367 = vmatprep.mubr.f32.mxu1 %v4068_v0  ;;  %3147 = vmatprep.subr.bf16.mxu0 %v4200_v42  ;;  %v473_v63 = vld [vmem:[#allocation5 + $0x128] sm:$0xff]  ;;  %v118_v1 = vld [vmem:[%s4909_s0 + $0x18] sm:$0xff]  ;;  %v4230_v2 = vpack.c.bf16 %v464_v57, %v460_v56  ;;  %v4234_v5 = vpack.c.bf16 %v466_v60, %v462_v59  ;;  %v468_v6 = vld [vmem:[#allocation5 + $0x100] sm:$0xff] }
  0x22   :  { %2661 = vmatmul.mubr.msk.f32.gmra.mrb[4].mxu0 %vm153_vm0, %v117_v46  ;;  %3179 = vmatprep.subr.bf16.mxu1 %v4207_v47  ;;  %v471_v3 = vld [vmem:[#allocation5 + $0x118] sm:$0xff]  ;;  %v472_v7 = vld [vmem:[#allocation5 + $0x120] sm:$0xff]  ;;  %v4238_v8 = vpack.c.bf16 %v473_v63, %v469_v62  ;;  %v470_v9 = vld [vmem:[#allocation5 + $0x110] sm:$0xff] }
  0x23   :  { %2669 = vmatmul.mubr.msk.f32.gmra.mrb[4].mxu1 %vm153_vm0, %v117_v46  ;;  %3149 = vmatpush1.bf16.msra.mxu0 %v4211_v50  ;;  %v475_v4 = vld [vmem:[#allocation5 + $0x138] sm:$0xff]  ;;  %v474_v10 = vld [vmem:[#allocation5 + $0x130] sm:$0xff]  ;;  %v477_v12 = vld [vmem:[#allocation5 + $0x148] sm:$0xff]  ;;  %v4249_v15 = vpack.c.bf16 %v472_v7, %v468_v6 }
  0x24   :  { %3181 = vmatpush1.bf16.msra.mxu1 %v4215_v54  ;;  %260 = vmatprep.mubr.f32.mxu0 %v4068_v0  ;;  %v4242_v11 = vpack.c.bf16 %v475_v4, %v471_v3  ;;  %v481_v13 = vld [vmem:[#allocation5 + $0x168] sm:$0xff]  ;;  %v119_v14 = vld [vmem:[%s4909_s0 + $0x20] sm:$0xff]  ;;  %v479_v16 = vld [vmem:[#allocation5 + $0x158] sm:$0xff]  ;;  %v4253_v19 = vpack.c.bf16 %v474_v10, %v470_v9 }
  0x25   :  { %373 = vmatprep.mubr.f32.mxu1 %v4068_v0  ;;  %3151 = vmatprep.subr.bf16.mxu0 %v4219_v58  ;;  %v483_v18 = vld [vmem:[#allocation5 + $0x178] sm:$0xff]  ;;  %v476_v20 = vld [vmem:[#allocation5 + $0x140] sm:$0xff]  ;;  %v4257_v24 = vpack.c.bf16 %v481_v13, %v477_v12  ;;  %v478_v26 = vld [vmem:[#allocation5 + $0x150] sm:$0xff] }
  0x26   :  { %2662 = vmatmul.mubr.msk.f32.gmra.mrb[6].mxu0 %vm153_vm0, %v118_v1  ;;  %3183 = vmatprep.subr.bf16.mxu1 %v4223_v61  ;;  %v480_v23 = vld [vmem:[#allocation5 + $0x160] sm:$0xff]  ;;  %v482_v27 = vld [vmem:[#allocation5 + $0x170] sm:$0xff]  ;;  %v4261_v28 = vpack.c.bf16 %v483_v18, %v479_v16  ;;  %v485_v30 = vld [vmem:[#allocation5 + $0x188] sm:$0xff]  ;;  %v4069_v16 = vmov 0.0|0.0  }
  0x27   :  { %2670 = vmatmul.mubr.msk.f32.gmra.mrb[6].mxu1 %vm153_vm0, %v118_v1  ;;  %3153 = vmatpush1.bf16.msra.mxu0 %v4230_v2  ;;  %v489_v31 = vld [vmem:[#allocation5 + $0x1a8] sm:$0xff]  ;;  %v4268_v33 = vpack.c.bf16 %v480_v23, %v476_v20  ;;  %v487_v36 = vld [vmem:[#allocation5 + $0x198] sm:$0xff]  ;;  %v4272_v39 = vpack.c.bf16 %v482_v27, %v478_v26  ;;  %v484_v40 = vld [vmem:[#allocation5 + $0x180] sm:$0xff] }
  0x28   :  { %3185 = vmatpush1.bf16.msra.mxu1 %v4234_v5  ;;  %266 = vmatprep.mubr.f32.mxu0 %v4068_v0  ;;  %v120_v32 = vld [vmem:[%s4909_s0 + $0x28] sm:$0xff]  ;;  %v491_v37 = vld [vmem:[#allocation5 + $0x1b8] sm:$0xff]  ;;  %v488_v41 = vld [vmem:[#allocation5 + $0x1a0] sm:$0xff]  ;;  %v4276_v43 = vpack.c.bf16 %v489_v31, %v485_v30 }
  0x29   :  { %379 = vmatprep.mubr.f32.mxu1 %v4068_v0  ;;  %3155 = vmatprep.subr.bf16.mxu0 %v4238_v8  ;;  %v486_v44 = vld [vmem:[#allocation5 + $0x190] sm:$0xff]  ;;  %v4280_v46 = vpack.c.bf16 %v491_v37, %v487_v36  ;;  %v493_v48 = vld [vmem:[#allocation5 + $0x1c8] sm:$0xff]  ;;  %v4287_v52 = vpack.c.bf16 %v488_v41, %v484_v40  ;;  %v495_v53 = vld [vmem:[#allocation5 + $0x1d8] sm:$0xff] }
  0x2a   :  { %2663 = vmatmul.mubr.msk.f32.gmra.mrb[8].mxu0 %vm153_vm0, %v119_v14  ;;  %3187 = vmatprep.subr.bf16.mxu1 %v4242_v11  ;;  %v490_v45 = vld [vmem:[#allocation5 + $0x1b0] sm:$0xff]  ;;  %v497_v49 = vld [vmem:[#allocation5 + $0x1e8] sm:$0xff]  ;;  %v499_v55 = vld [vmem:[#allocation5 + $0x1f8] sm:$0xff] }
  0x2b   :  { %2671 = vmatmul.mubr.msk.f32.gmra.mrb[8].mxu1 %vm153_vm0, %v119_v14  ;;  %3157 = vmatpush1.bf16.msra.mxu0 %v4249_v15  ;;  %v121_v51 = vld [vmem:[%s4909_s0 + $0x30] sm:$0xff]  ;;  %v4291_v56 = vpack.c.bf16 %v490_v45, %v486_v44  ;;  %v492_v57 = vld [vmem:[#allocation5 + $0x1c0] sm:$0xff]  ;;  %v4295_v60 = vpack.c.bf16 %v497_v49, %v493_v48  ;;  %v4299_v1 = vpack.c.bf16 %v499_v55, %v495_v53  ;;  %v122_v3 = vld [vmem:[%s4909_s0 + $0x38] sm:$0xff] }
  0x2c   :  { %3189 = vmatpush1.bf16.msra.mxu1 %v4253_v19  ;;  %272 = vmatprep.mubr.f32.mxu0 %v4068_v0  ;;  %v496_v59 = vld [vmem:[#allocation5 + $0x1e0] sm:$0xff]  ;;  %v494_v62 = vld [vmem:[#allocation5 + $0x1d0] sm:$0xff]  ;;  %v501_v13 = vld [vmem:[%s4916_s7 + $0x8] sm:$0xff] }
  0x2d   :  { %385 = vmatprep.mubr.f32.mxu1 %v4068_v0  ;;  %3159 = vmatprep.subr.bf16.mxu0 %v4257_v24  ;;  %v498_v63 = vld [vmem:[#allocation5 + $0x1f0] sm:$0xff]  ;;  %v4306_v4 = vpack.c.bf16 %v496_v59, %v492_v57  ;;  %v111_v6 = vld [vmem:[%s4911_s2] sm:$0xff]  ;;  %v503_v20 = vld [vmem:[%s4916_s7 + $0x18] sm:$0xff] }
  0x2e   :  { %2664 = vmatmul.mubr.msk.f32.gmra.mrb[10].mxu0 %vm153_vm0, %v120_v32  ;;  %3191 = vmatprep.subr.bf16.mxu1 %v4261_v28  ;;  %v4314_v7 = vld [vmem:[%s4910_s1] sm:$0xff]  ;;  %v4318_v9 = vpack.c.bf16 %v498_v63, %v494_v62  ;;  %v502_v18 = vld [vmem:[%s4916_s7 + $0x10] sm:$0xff]  ;;  %v505_v27 = vld [vmem:[%s4916_s7 + $0x28] sm:$0xff]  ;;  %v133_v62 = vlaneseq }
  0x2f   :  { %2672 = vmatmul.mubr.msk.f32.gmra.mrb[10].mxu1 %vm153_vm0, %v120_v32  ;;  %3161 = vmatpush1.bf16.msra.mxu0 %v4268_v33  ;;  %v520_v10 = vmul.f32 %v4314_v7, %v111_v6  ;;  %v500_v12 = vld [vmem:[%s4916_s7] sm:$0xff]  ;;  %v4365_v23 = vpack.c.bf16 %v503_v20, %v502_v18  ;;  %v506_v31 = vld [vmem:[%s4916_s7 + $0x30] sm:$0xff]  ;;  %v507_v32 = vld [vmem:[%s4916_s7 + $0x38] sm:$0xff] }
  0x30   :  { %3193 = vmatpush1.bf16.msra.mxu1 %v4272_v39  ;;  %278 = vmatprep.mubr.f32.mxu0 %v4068_v0  ;;  %v4353_v14 = vpack.c.bf16 %v501_v13, %v500_v12  ;;  %v504_v26 = vld [vmem:[%s4916_s7 + $0x20] sm:$0xff]  ;;  %v4385_v36 = vpack.c.bf16 %v507_v32, %v506_v31  ;;  %v509_v40 = vld [vmem:[%s4916_s7 + $0x48] sm:$0xff]  ;;  %v510_v44 = vld [vmem:[%s4916_s7 + $0x50] sm:$0xff]  ;;  %v134_v63 = vshrl.u32 %v133_v62, 7 }
  0x31   :  { %391 = vmatprep.mubr.f32.mxu1 %v4068_v0  ;;  %3163 = vmatprep.subr.bf16.mxu0 %v4276_v43  ;;  %v4375_v30 = vpack.c.bf16 %v505_v27, %v504_v26  ;;  %v508_v37 = vld [vmem:[%s4916_s7 + $0x40] sm:$0xff]  ;;  %v511_v45 = vld [vmem:[%s4916_s7 + $0x58] sm:$0xff]  ;;  %v514_v55 = vld [vmem:[%s4916_s7 + $0x70] sm:$0xff] }
  0x32   :  { %2665 = vmatmul.mubr.msk.f32.gmra.mrb[12].mxu0 %vm153_vm0, %v121_v51  ;;  %3195 = vmatprep.subr.bf16.mxu1 %v4280_v46  ;;  %v4395_v41 = vpack.c.bf16 %v509_v40, %v508_v37  ;;  %v4405_v48 = vpack.c.bf16 %v511_v45, %v510_v44  ;;  %v512_v49 = vld [vmem:[%s4916_s7 + $0x60] sm:$0xff]  ;;  %v515_v57 = vld [vmem:[%s4916_s7 + $0x78] sm:$0xff]  ;;  %v147_v20 = vsub.s32 3, %v134_v63 }
  0x33   :  { %2673 = vmatmul.mubr.msk.f32.gmra.mrb[12].mxu1 %vm153_vm0, %v121_v51  ;;  %3165 = vmatpush1.bf16.msra.mxu0 %v4287_v52  ;;  %v513_v51 = vld [vmem:[%s4916_s7 + $0x68] sm:$0xff]  ;;  %v4426_v59 = vpack.c.bf16 %v515_v57, %v514_v55  ;;  %v131_v6 = vld [vmem:[%s4915_s6] sm:$0xf] }
  0x34   :  { %3197 = vmatpush1.bf16.msra.mxu1 %v4291_v56  ;;  %284 = vmatprep.mubr.f32.mxu0 %v4068_v0  ;;  %v4416_v53 = vpack.c.bf16 %v513_v51, %v512_v49  ;;  %v4440_v45 = vrot.slane %v131_v6, %v147_v20  ;;  %v143_v49 = vsub.s32 2, %v134_v63 }
  0x35   :  { %397 = vmatprep.mubr.f32.mxu1 %v4068_v0  ;;  %3167 = vmatprep.subr.bf16.mxu0 %v4295_v60 }
  0x36   :  { %2666 = vmatmul.mubr.msk.f32.gmra.mrb[14].mxu0 %vm153_vm0, %v122_v3  ;;  %3199 = vmatprep.subr.bf16.mxu1 %v4299_v1  ;;  %v4443_v55 = vrot.slane %v131_v6, %v143_v49  ;;  %v2679_v49 = vld [vmem:[%s4910_s1 + $0x8] sm:$0xff] }
  0x37   :  { %2674 = vmatmul.mubr.msk.f32.gmra.mrb[14].mxu1 %vm153_vm0, %v122_v3  ;;  %3169 = vmatpush1.bf16.msra.mxu0 %v4306_v4  ;;  %v135_v3 = vsub.s32 0, %v134_v63 }
  0x38   :  { %3201 = vmatpush1.bf16.msra.mxu1 %v4318_v9  ;;  %593 = vmatprep.mubr.f32.mxu0 %v4068_v0 }
  0x39   :  { %664 = vmatprep.mubr.f32.mxu1 %v4068_v0  ;;  %3259 = vmatprep.subr.bf16.mxu1 %v4174_v21  ;;  %v4434_v12 = vrot.slane %v131_v6, %v135_v3 }
  0x3a   :  { %594 = vmatmul.mubr.f32.vlgmr.msra.gmra.mrb[0].mxu0 %v520_v10  ;;  %3202 = vmatprep.subr.bf16.mxu0 %v4069_v16 }
  0x3b   :  { %665 = vmatmul.mubr.f32.vlgmr.msra.gmra.mrb[0].mxu1 %v520_v10  ;;  %3204 = vmatpush3.bf16.msra.mxu0 %v4353_v14  ;;  %v139_v10 = vsub.s32 1, %v134_v63  ;;  %v113_v63 = vld [vmem:[%s4912_s3] sm:$0xff] }
  0x3c   :  { %3261 = vmatpush1.bf16.msra.mxu1 %v4179_v25  ;;  %929 = vmatprep.mubr.f32.mxu1 %v4068_v0 }
  0x3d   :  { %3263 = vmatprep.subr.bf16.mxu1 %v4190_v34  ;;  %3205 = vmatprep.subr.bf16.mxu0 %v4069_v16  ;;  %v4436_v13 = vrot.slane %v131_v6, %v139_v10 }
  0x3e   :  { %2882 = vmatprep.mubr.msk.f32.mxu0 %vm4070_vm1, %v4068_v0 }
  0x3f   :  { %3207 = vmatpush3.bf16.msra.mxu0 %v4365_v23 }
  0x40   :  { %3265 = vmatpush1.bf16.msra.mxu1 %v4196_v38  ;;  %3208 = vmatprep.subr.bf16.mxu0 %v4069_v16 }
  0x41   :  { %3267 = vmatprep.subr.bf16.mxu1 %v4207_v47 }
  0x43   :  { %3210 = vmatpush3.bf16.msra.mxu0 %v4375_v30 }
  0x44   :  { %3269 = vmatpush1.bf16.msra.mxu1 %v4215_v54  ;;  %3211 = vmatprep.subr.bf16.mxu0 %v4069_v16 }
  0x45   :  { %3271 = vmatprep.subr.bf16.mxu1 %v4223_v61 }
  0x47   :  { %3213 = vmatpush3.bf16.msra.mxu0 %v4385_v36 }
  0x48   :  { %3273 = vmatpush1.bf16.msra.mxu1 %v4234_v5  ;;  %3214 = vmatprep.subr.bf16.mxu0 %v4069_v16 }
  0x49   :  { %3275 = vmatprep.subr.bf16.mxu1 %v4242_v11 }
  0x4b   :  { %3216 = vmatpush3.bf16.msra.mxu0 %v4395_v41 }
  0x4c   :  { %3277 = vmatpush1.bf16.msra.mxu1 %v4253_v19  ;;  %3217 = vmatprep.subr.bf16.mxu0 %v4069_v16 }
  0x4d   :  { %3279 = vmatprep.subr.bf16.mxu1 %v4261_v28 }
  0x4f   :  { %3219 = vmatpush3.bf16.msra.mxu0 %v4405_v48 }
  0x50   :  { %3281 = vmatpush1.bf16.msra.mxu1 %v4272_v39  ;;  %3220 = vmatprep.subr.bf16.mxu0 %v4069_v16 }
  0x51   :  { %3283 = vmatprep.subr.bf16.mxu1 %v4280_v46 }
  0x53   :  { %3222 = vmatpush3.bf16.msra.mxu0 %v4416_v53 }
  0x54   :  { %3285 = vmatpush1.bf16.msra.mxu1 %v4291_v56  ;;  %3223 = vmatprep.subr.bf16.mxu0 %v4069_v16 }
  0x55   :  { %3287 = vmatprep.subr.bf16.mxu1 %v4299_v1 }
  0x57   :  { %3225 = vmatpush3.bf16.msra.mxu0 %v4426_v59 }
  0x58   :  { %3289 = vmatpush1.bf16.msra.mxu1 %v4318_v9  ;;  %3227 = vmatprep.subr.bf16.mxu0 %v4172_v17 }
  0x59   :  { %3290 = vmatprep.subr.bf16.mxu1 %v4069_v16 }
 0x10d   :  { %v595_v18 = vpop.f32.mrb[0].mxu0 }
 0x10e   :  { %v3842_v26 = vadd.f32 %v595_v18, %v4434_v12  ;;  %v666_v27 = vpop.f32.mrb[0].mxu1  ;;  %v597_v31 = vpop.f32.mrb[1].mxu0 }
 0x10f   :  { %v3843_v32 = vadd.f32 %v597_v31, %v4436_v13  ;;  %v668_v37 = vpop.f32.mrb[1].mxu1  ;;  %v3858_v62 = vadd.f32 %v666_v27, %v4443_v55 }
 0x110   :  { %v2675_v40 = vmul.f32 -1.442695, %v3842_v26  ;;  %v3859_v51 = vadd.f32 %v668_v37, %v4440_v45  ;;  %v521_v26 = vmul.f32 %v4314_v7, %v113_v63 }
 0x111   :  { %v2676_v44 = vmul.f32 -1.442695, %v3843_v32 }
 0x112   :  { %3912 = vpow2.f32 %v2675_v40  ;;  %v2677_v57 = vmul.f32 -1.442695, %v3859_v51 }
 0x113   :  { %3914 = vpow2.f32 %v2676_v44 }
 0x114   :  { %3916 = vpow2.f32 %v2677_v57 }
 0x115   :  { %3918 = vtanh.f32 %v3858_v62 }
 0x11c   :  { %v3913_v3 = vpop.eup %3912 }
 0x11d   :  { %v3915_v10 = vpop.eup %3914  ;;  %v678_v18 = vadd.f32 1.0, %v3913_v3 }
 0x11e   :  { %v684_v31 = vadd.f32 1.0, %v3915_v10  ;;  %v3917_v20 = vpop.eup %3916 }
 0x11f   :  { %3920 = vrcp.f32 %v678_v18  ;;  %v3919_v6 = vpop.eup %3918  ;;  %v691_v27 = vadd.f32 1.0, %v3917_v20  ;;  %v4510_v18 = vld [vmem:[%s4917_s8] ss:$0 sm:$0xff] }
 0x120   :  { %3922 = vrcp.f32 %v684_v31 }
 0x121   :  { %3924 = vrcp.f32 %v691_v27 }
 0x129   :  { %v3921_v32 = vpop.eup %3920 }
 0x12a   :  { %v3923_v37 = vpop.eup %3922  ;;  %v695_v40 = vmul.f32 %v3921_v32, %v3919_v6 }
 0x12b   :  { %v694_v44 = vmul.f32 %v3923_v37, %v521_v26  ;;  %v3925_v62 = vpop.eup %3924 }
 0x12d   :  { %v696_v51 = vadd.f32 %v695_v40, %v694_v44 }
 0x12f   :  { %3926 = vtanh.f32 %v696_v51  ;;  %v4453_v57 = vmul.f32 %v2679_v49, %v696_v51 }
 0x139   :  { %v3927_v3 = vpop.eup %3926 }
 0x13a   :  { %v698_v10 = vmul.f32 %v3927_v3, %v3925_v62 }
 0x13c   :  { %2883 = vmatmul.mubr.f32.vlgmr.msra.gmra.mrb[16].mxu0 %v698_v10  ;;  %v785_v7 = vmul.f32 %v2679_v49, %v698_v10 }
 0x13d   :  { %3229 = vmatpush1.bf16.msra.mxu0 %v4176_v22  ;;  %858 = vmatprep.mubr.f32.mxu0 %v4068_v0 }
 0x13e   :  { %930 = vmatmul.mubr.f32.vlgmr.msra.gmra.mrb[2].mxu1 %v785_v7  ;;  %3231 = vmatprep.subr.bf16.mxu0 %v4183_v29 }
 0x13f   :  { %3292 = vmatpush3.bf16.msra.mxu1 %v4353_v14  ;;  %2917 = vmatprep.mubr.msk.f32.mxu1 %vm4070_vm1, %v4068_v0 }
 0x140   :  { %3293 = vmatprep.subr.bf16.mxu1 %v4069_v16 }
 0x141   :  { %3233 = vmatpush1.bf16.msra.mxu0 %v4192_v35 }
 0x142   :  { %3235 = vmatprep.subr.bf16.mxu0 %v4200_v42 }
 0x143   :  { %3295 = vmatpush3.bf16.msra.mxu1 %v4365_v23 }
 0x144   :  { %3296 = vmatprep.subr.bf16.mxu1 %v4069_v16 }
 0x145   :  { %3237 = vmatpush1.bf16.msra.mxu0 %v4211_v50 }
 0x146   :  { %3239 = vmatprep.subr.bf16.mxu0 %v4219_v58 }
 0x147   :  { %3298 = vmatpush3.bf16.msra.mxu1 %v4375_v30 }
 0x148   :  { %3299 = vmatprep.subr.bf16.mxu1 %v4069_v16 }
 0x149   :  { %3241 = vmatpush1.bf16.msra.mxu0 %v4230_v2 }
 0x14a   :  { %3243 = vmatprep.subr.bf16.mxu0 %v4238_v8 }
 0x14b   :  { %3301 = vmatpush3.bf16.msra.mxu1 %v4385_v36 }
 0x14c   :  { %3302 = vmatprep.subr.bf16.mxu1 %v4069_v16 }
 0x14d   :  { %3245 = vmatpush1.bf16.msra.mxu0 %v4249_v15 }
 0x14e   :  { %3247 = vmatprep.subr.bf16.mxu0 %v4257_v24 }
 0x14f   :  { %3304 = vmatpush3.bf16.msra.mxu1 %v4395_v41 }
 0x150   :  { %3305 = vmatprep.subr.bf16.mxu1 %v4069_v16 }
 0x151   :  { %3249 = vmatpush1.bf16.msra.mxu0 %v4268_v33 }
 0x152   :  { %3251 = vmatprep.subr.bf16.mxu0 %v4276_v43 }
 0x153   :  { %3307 = vmatpush3.bf16.msra.mxu1 %v4405_v48 }
 0x154   :  { %3308 = vmatprep.subr.bf16.mxu1 %v4069_v16 }
 0x155   :  { %3253 = vmatpush1.bf16.msra.mxu0 %v4287_v52 }
 0x156   :  { %3255 = vmatprep.subr.bf16.mxu0 %v4295_v60 }
 0x157   :  { %3310 = vmatpush3.bf16.msra.mxu1 %v4416_v53 }
 0x158   :  { %3311 = vmatprep.subr.bf16.mxu1 %v4069_v16 }
 0x159   :  { %3257 = vmatpush1.bf16.msra.mxu0 %v4306_v4 }
 0x15a   :  { %3315 = vmatprep.subr.bf16.mxu0 %v4172_v17 }
 0x15b   :  { %3313 = vmatpush3.bf16.msra.mxu1 %v4426_v59 }
 0x15c   :  { %859 = vmatmul.mubr.f32.vlgmr.msra.gmra.mrb[2].mxu0 %v785_v7  ;;  %3347 = vmatprep.subr.bf16.mxu1 %v4174_v21 }
 0x15d   :  { %3317 = vmatpush1.bf16.msra.mxu0 %v4176_v22  ;;  %1118 = vmatprep.mubr.f32.mxu0 %v4068_v0 }
 0x15e   :  { %3319 = vmatprep.subr.bf16.mxu0 %v4183_v29 }
 0x161   :  { %3321 = vmatpush1.bf16.msra.mxu0 %v4192_v35 }
 0x162   :  { %3323 = vmatprep.subr.bf16.mxu0 %v4200_v42 }
 0x165   :  { %3325 = vmatpush1.bf16.msra.mxu0 %v4211_v50 }
 0x166   :  { %3327 = vmatprep.subr.bf16.mxu0 %v4219_v58 }
 0x169   :  { %3329 = vmatpush1.bf16.msra.mxu0 %v4230_v2 }
 0x16a   :  { %3331 = vmatprep.subr.bf16.mxu0 %v4238_v8 }
 0x16d   :  { %3333 = vmatpush1.bf16.msra.mxu0 %v4249_v15 }
 0x16e   :  { %3335 = vmatprep.subr.bf16.mxu0 %v4257_v24 }
 0x171   :  { %3337 = vmatpush1.bf16.msra.mxu0 %v4268_v33 }
 0x172   :  { %3339 = vmatprep.subr.bf16.mxu0 %v4276_v43 }
 0x175   :  { %3341 = vmatpush1.bf16.msra.mxu0 %v4287_v52 }
 0x176   :  { %3343 = vmatprep.subr.bf16.mxu0 %v4295_v60 }
 0x179   :  { %3345 = vmatpush1.bf16.msra.mxu0 %v4306_v4 }
 0x17a   :  { %3378 = vmatprep.subr.bf16.mxu0 %v4069_v16 }
 0x20f   :  { %v771_v31 = vpop.f32.mrb[16].mxu0 }
 0x210   :  { %v772_v63 = vadd.f32 %v4510_v18, %v771_v31  ;;  %v2884_v20 = vpop.f32.mrb[17].mxu0 }
 0x211   :  { %v931_v26 = vpop.f32.mrb[2].mxu1 }
 0x212   :  { %775 = vst [vmem:[%s4918_s9] sm:$0xff] %v772_v63  ;;  %v933_v6 = vpop.f32.mrb[3].mxu1  ;;  %v3860_v3 = vadd.f32 %v931_v26, %v4443_v55  ;;  %v2684_v26 = vld [vmem:[%s4910_s1 + $0x10] sm:$0xff] }
 0x213   :  { %v3861_v51 = vadd.f32 %v933_v6, %v4440_v45 }
 0x215   :  { %v2682_v62 = vmul.f32 -1.442695, %v3861_v51 }
 0x22f   :  { %v860_v32 = vpop.f32.mrb[2].mxu0 }
 0x230   :  { %v3844_v37 = vadd.f32 %v860_v32, %v4434_v12  ;;  %v862_v40 = vpop.f32.mrb[3].mxu0 }
 0x231   :  { %v3845_v27 = vadd.f32 %v862_v40, %v4436_v13 }
 0x232   :  { %v2680_v44 = vmul.f32 -1.442695, %v3844_v37 }
 0x233   :  { %v2681_v49 = vmul.f32 -1.442695, %v3845_v27 }
 0x234   :  { %3928 = vpow2.f32 %v2680_v44 }
 0x235   :  { %3930 = vpow2.f32 %v2681_v49 }
 0x236   :  { %3932 = vpow2.f32 %v2682_v62 }
 0x237   :  { %3934 = vtanh.f32 %v3860_v3 }
 0x23e   :  { %v3929_v10 = vpop.eup %3928 }
 0x23f   :  { %v3931_v7 = vpop.eup %3930  ;;  %v943_v31 = vadd.f32 1.0, %v3929_v10 }
 0x240   :  { %v949_v63 = vadd.f32 1.0, %v3931_v7  ;;  %v3933_v20 = vpop.eup %3932 }
 0x241   :  { %3936 = vrcp.f32 %v943_v31  ;;  %v3935_v32 = vpop.eup %3934  ;;  %v956_v27 = vadd.f32 1.0, %v3933_v20 }
 0x242   :  { %3938 = vrcp.f32 %v949_v63 }
 0x243   :  { %3940 = vrcp.f32 %v956_v27 }
 0x24b   :  { %v3937_v40 = vpop.eup %3936 }
 0x24c   :  { %v3939_v37 = vpop.eup %3938  ;;  %v960_v44 = vmul.f32 %v3937_v40, %v3935_v32 }
 0x24d   :  { %v959_v49 = vmul.f32 %v3939_v37, %v4453_v57  ;;  %v3941_v62 = vpop.eup %3940 }
 0x24f   :  { %v961_v6 = vadd.f32 %v960_v44, %v959_v49 }
 0x251   :  { %3942 = vtanh.f32 %v961_v6  ;;  %v4524_v51 = vmul.f32 %v2684_v26, %v961_v6 }
 0x25b   :  { %v3943_v3 = vpop.eup %3942 }
 0x25c   :  { %v963_v10 = vmul.f32 %v3943_v3, %v3941_v62 }
 0x25e   :  { %2918 = vmatmul.mubr.f32.vlgmr.msra.gmra.mrb[16].mxu1 %v963_v10  ;;  %v1045_v7 = vmul.f32 %v2684_v26, %v963_v10 }
 0x25f   :  { %3349 = vmatpush1.bf16.msra.mxu1 %v4179_v25  ;;  %1189 = vmatprep.mubr.f32.mxu1 %v4068_v0 }
 0x260   :  { %1119 = vmatmul.mubr.f32.vlgmr.msra.gmra.mrb[4].mxu0 %v1045_v7  ;;  %3351 = vmatprep.subr.bf16.mxu1 %v4190_v34 }
 0x261   :  { %3380 = vmatpush3.bf16.msra.mxu0 %v4353_v14  ;;  %2952 = vmatprep.mubr.msk.f32.mxu0 %vm4070_vm1, %v4068_v0 }
 0x262   :  { %3381 = vmatprep.subr.bf16.mxu0 %v4069_v16 }
 0x263   :  { %3353 = vmatpush1.bf16.msra.mxu1 %v4196_v38 }
 0x264   :  { %3355 = vmatprep.subr.bf16.mxu1 %v4207_v47 }
 0x265   :  { %3383 = vmatpush3.bf16.msra.mxu0 %v4365_v23 }
 0x266   :  { %3384 = vmatprep.subr.bf16.mxu0 %v4069_v16 }
 0x267   :  { %3357 = vmatpush1.bf16.msra.mxu1 %v4215_v54 }
 0x268   :  { %3359 = vmatprep.subr.bf16.mxu1 %v4223_v61 }
 0x269   :  { %3386 = vmatpush3.bf16.msra.mxu0 %v4375_v30 }
 0x26a   :  { %3387 = vmatprep.subr.bf16.mxu0 %v4069_v16 }
 0x26b   :  { %3361 = vmatpush1.bf16.msra.mxu1 %v4234_v5 }
 0x26c   :  { %3363 = vmatprep.subr.bf16.mxu1 %v4242_v11 }
 0x26d   :  { %3389 = vmatpush3.bf16.msra.mxu0 %v4385_v36 }
 0x26e   :  { %3390 = vmatprep.subr.bf16.mxu0 %v4069_v16 }
 0x26f   :  { %3365 = vmatpush1.bf16.msra.mxu1 %v4253_v19 }
 0x270   :  { %3367 = vmatprep.subr.bf16.mxu1 %v4261_v28 }
 0x271   :  { %3392 = vmatpush3.bf16.msra.mxu0 %v4395_v41 }
 0x272   :  { %3393 = vmatprep.subr.bf16.mxu0 %v4069_v16 }
 0x273   :  { %3369 = vmatpush1.bf16.msra.mxu1 %v4272_v39 }
 0x274   :  { %3371 = vmatprep.subr.bf16.mxu1 %v4280_v46 }
 0x275   :  { %3395 = vmatpush3.bf16.msra.mxu0 %v4405_v48 }
 0x276   :  { %3396 = vmatprep.subr.bf16.mxu0 %v4069_v16 }
 0x277   :  { %3373 = vmatpush1.bf16.msra.mxu1 %v4291_v56 }
 0x278   :  { %3375 = vmatprep.subr.bf16.mxu1 %v4299_v1 }
 0x279   :  { %3398 = vmatpush3.bf16.msra.mxu0 %v4416_v53 }
 0x27a   :  { %3399 = vmatprep.subr.bf16.mxu0 %v4069_v16 }
 0x27b   :  { %3377 = vmatpush1.bf16.msra.mxu1 %v4318_v9 }
 0x27c   :  { %3435 = vmatprep.subr.bf16.mxu1 %v4174_v21 }
 0x27d   :  { %3401 = vmatpush3.bf16.msra.mxu0 %v4426_v59 }
 0x27e   :  { %1190 = vmatmul.mubr.f32.vlgmr.msra.gmra.mrb[4].mxu1 %v1045_v7  ;;  %3403 = vmatprep.subr.bf16.mxu0 %v4172_v17 }
 0x27f   :  { %3437 = vmatpush1.bf16.msra.mxu1 %v4179_v25  ;;  %1449 = vmatprep.mubr.f32.mxu1 %v4068_v0 }
 0x280   :  { %3439 = vmatprep.subr.bf16.mxu1 %v4190_v34 }
 0x283   :  { %3441 = vmatpush1.bf16.msra.mxu1 %v4196_v38 }
 0x284   :  { %3443 = vmatprep.subr.bf16.mxu1 %v4207_v47 }
 0x287   :  { %3445 = vmatpush1.bf16.msra.mxu1 %v4215_v54 }
 0x288   :  { %3447 = vmatprep.subr.bf16.mxu1 %v4223_v61 }
 0x28b   :  { %3449 = vmatpush1.bf16.msra.mxu1 %v4234_v5 }
 0x28c   :  { %3451 = vmatprep.subr.bf16.mxu1 %v4242_v11 }
 0x28f   :  { %3453 = vmatpush1.bf16.msra.mxu1 %v4253_v19 }
 0x290   :  { %3455 = vmatprep.subr.bf16.mxu1 %v4261_v28 }
 0x293   :  { %3457 = vmatpush1.bf16.msra.mxu1 %v4272_v39 }
 0x294   :  { %3459 = vmatprep.subr.bf16.mxu1 %v4280_v46 }
 0x297   :  { %3461 = vmatpush1.bf16.msra.mxu1 %v4291_v56 }
 0x298   :  { %3463 = vmatprep.subr.bf16.mxu1 %v4299_v1 }
 0x29b   :  { %3465 = vmatpush1.bf16.msra.mxu1 %v4318_v9 }
 0x29c   :  { %3466 = vmatprep.subr.bf16.mxu1 %v4069_v16 }
 0x331   :  { %v1030_v57 = vpop.f32.mrb[16].mxu1 }
 0x332   :  { %v1031_v31 = vadd.f32 %v4510_v18, %v1030_v57  ;;  %v2919_v63 = vpop.f32.mrb[17].mxu1 }
 0x333   :  { %v1120_v20 = vpop.f32.mrb[4].mxu0 }
 0x334   :  { %2683 = vst [vmem:[%s4918_s9 + $0x8] sm:$0xff] %v1031_v31  ;;  %v1122_v32 = vpop.f32.mrb[5].mxu0  ;;  %v3846_v27 = vadd.f32 %v1120_v20, %v4434_v12 }
 0x335   :  { %v3847_v40 = vadd.f32 %v1122_v32, %v4436_v13 }
 0x336   :  { %v2685_v44 = vmul.f32 -1.442695, %v3846_v27  ;;  %v2689_v27 = vld [vmem:[%s4910_s1 + $0x18] sm:$0xff] }
 0x337   :  { %v2686_v37 = vmul.f32 -1.442695, %v3847_v40 }
 0x339   :  { %3944 = vpow2.f32 %v2686_v37 }
 0x33a   :  { %3946 = vpow2.f32 %v2685_v44 }
 0x343   :  { %v3945_v49 = vpop.eup %3944 }
 0x344   :  { %v1209_v26 = vadd.f32 1.0, %v3945_v49  ;;  %v3947_v6 = vpop.eup %3946 }
 0x345   :  { %v1203_v62 = vadd.f32 1.0, %v3947_v6 }
 0x346   :  { %3948 = vrcp.f32 %v1209_v26 }
 0x347   :  { %3950 = vrcp.f32 %v1203_v62 }
 0x350   :  { %v3949_v3 = vpop.eup %3948 }
 0x351   :  { %v1219_v10 = vmul.f32 %v3949_v3, %v4524_v51  ;;  %v1191_v7 = vpop.f32.mrb[4].mxu1  ;;  %v3951_v20 = vpop.eup %3950 }
 0x352   :  { %v3862_v57 = vadd.f32 %v1191_v7, %v4443_v55  ;;  %v1193_v31 = vpop.f32.mrb[5].mxu1 }
 0x353   :  { %v3863_v63 = vadd.f32 %v1193_v31, %v4440_v45 }
 0x354   :  { %3952 = vtanh.f32 %v3862_v57 }
 0x355   :  { %v2687_v32 = vmul.f32 -1.442695, %v3863_v63 }
 0x357   :  { %3954 = vpow2.f32 %v2687_v32 }
 0x35e   :  { %v3953_v40 = vpop.eup %3952 }
 0x35f   :  { %v1220_v37 = vmul.f32 %v3953_v40, %v3951_v20 }
 0x361   :  { %v3955_v44 = vpop.eup %3954  ;;  %v1221_v49 = vadd.f32 %v1220_v37, %v1219_v10 }
 0x362   :  { %v1216_v51 = vadd.f32 1.0, %v3955_v44 }
 0x363   :  { %3956 = vtanh.f32 %v1221_v49  ;;  %v4590_v26 = vmul.f32 %v2689_v27, %v1221_v49 }
 0x364   :  { %3958 = vrcp.f32 %v1216_v51 }
 0x36d   :  { %v3957_v6 = vpop.eup %3956 }
 0x36e   :  { %v3959_v62 = vpop.eup %3958 }
 0x36f   :  { %v1223_v3 = vmul.f32 %v3959_v62, %v3957_v6 }
 0x371   :  { %2953 = vmatmul.mubr.f32.vlgmr.msra.gmra.mrb[18].mxu0 %v1223_v3  ;;  %v1305_v7 = vmul.f32 %v2689_v27, %v1223_v3 }
 0x372   :  { %3405 = vmatpush1.bf16.msra.mxu0 %v4176_v22  ;;  %1378 = vmatprep.mubr.f32.mxu0 %v4068_v0 }
 0x373   :  { %1450 = vmatmul.mubr.f32.vlgmr.msra.gmra.mrb[6].mxu1 %v1305_v7  ;;  %3407 = vmatprep.subr.bf16.mxu0 %v4183_v29 }
 0x374   :  { %3468 = vmatpush3.bf16.msra.mxu1 %v4353_v14  ;;  %2987 = vmatprep.mubr.msk.f32.mxu1 %vm4070_vm1, %v4068_v0 }
 0x375   :  { %3469 = vmatprep.subr.bf16.mxu1 %v4069_v16 }
 0x376   :  { %3409 = vmatpush1.bf16.msra.mxu0 %v4192_v35 }
 0x377   :  { %3411 = vmatprep.subr.bf16.mxu0 %v4200_v42 }
 0x378   :  { %3471 = vmatpush3.bf16.msra.mxu1 %v4365_v23 }
 0x379   :  { %3472 = vmatprep.subr.bf16.mxu1 %v4069_v16 }
 0x37a   :  { %3413 = vmatpush1.bf16.msra.mxu0 %v4211_v50 }
 0x37b   :  { %3415 = vmatprep.subr.bf16.mxu0 %v4219_v58 }
 0x37c   :  { %3474 = vmatpush3.bf16.msra.mxu1 %v4375_v30 }
 0x37d   :  { %3475 = vmatprep.subr.bf16.mxu1 %v4069_v16 }
 0x37e   :  { %3417 = vmatpush1.bf16.msra.mxu0 %v4230_v2 }
 0x37f   :  { %3419 = vmatprep.subr.bf16.mxu0 %v4238_v8 }
 0x380   :  { %3477 = vmatpush3.bf16.msra.mxu1 %v4385_v36 }
 0x381   :  { %3478 = vmatprep.subr.bf16.mxu1 %v4069_v16 }
 0x382   :  { %3421 = vmatpush1.bf16.msra.mxu0 %v4249_v15 }
 0x383   :  { %3423 = vmatprep.subr.bf16.mxu0 %v4257_v24 }
 0x384   :  { %3480 = vmatpush3.bf16.msra.mxu1 %v4395_v41 }
 0x385   :  { %3481 = vmatprep.subr.bf16.mxu1 %v4069_v16 }
 0x386   :  { %3425 = vmatpush1.bf16.msra.mxu0 %v4268_v33 }
 0x387   :  { %3427 = vmatprep.subr.bf16.mxu0 %v4276_v43 }
 0x388   :  { %3483 = vmatpush3.bf16.msra.mxu1 %v4405_v48 }
 0x389   :  { %3484 = vmatprep.subr.bf16.mxu1 %v4069_v16 }
 0x38a   :  { %3429 = vmatpush1.bf16.msra.mxu0 %v4287_v52 }
 0x38b   :  { %3431 = vmatprep.subr.bf16.mxu0 %v4295_v60 }
 0x38c   :  { %3486 = vmatpush3.bf16.msra.mxu1 %v4416_v53 }
 0x38d   :  { %3487 = vmatprep.subr.bf16.mxu1 %v4069_v16 }
 0x38e   :  { %3433 = vmatpush1.bf16.msra.mxu0 %v4306_v4 }
 0x38f   :  { %3491 = vmatprep.subr.bf16.mxu0 %v4172_v17 }
 0x390   :  { %3489 = vmatpush3.bf16.msra.mxu1 %v4426_v59 }
 0x391   :  { %1379 = vmatmul.mubr.f32.vlgmr.msra.gmra.mrb[6].mxu0 %v1305_v7  ;;  %3523 = vmatprep.subr.bf16.mxu1 %v4174_v21 }
 0x392   :  { %3493 = vmatpush1.bf16.msra.mxu0 %v4176_v22  ;;  %1638 = vmatprep.mubr.f32.mxu0 %v4068_v0 }
 0x393   :  { %3495 = vmatprep.subr.bf16.mxu0 %v4183_v29 }
 0x396   :  { %3497 = vmatpush1.bf16.msra.mxu0 %v4192_v35 }
 0x397   :  { %3499 = vmatprep.subr.bf16.mxu0 %v4200_v42 }
 0x39a   :  { %3501 = vmatpush1.bf16.msra.mxu0 %v4211_v50 }
 0x39b   :  { %3503 = vmatprep.subr.bf16.mxu0 %v4219_v58 }
 0x39e   :  { %3505 = vmatpush1.bf16.msra.mxu0 %v4230_v2 }
 0x39f   :  { %3507 = vmatprep.subr.bf16.mxu0 %v4238_v8 }
 0x3a2   :  { %3509 = vmatpush1.bf16.msra.mxu0 %v4249_v15 }
 0x3a3   :  { %3511 = vmatprep.subr.bf16.mxu0 %v4257_v24 }
 0x3a6   :  { %3513 = vmatpush1.bf16.msra.mxu0 %v4268_v33 }
 0x3a7   :  { %3515 = vmatprep.subr.bf16.mxu0 %v4276_v43 }
 0x3aa   :  { %3517 = vmatpush1.bf16.msra.mxu0 %v4287_v52 }
 0x3ab   :  { %3519 = vmatprep.subr.bf16.mxu0 %v4295_v60 }
 0x3ae   :  { %3521 = vmatpush1.bf16.msra.mxu0 %v4306_v4 }
 0x3af   :  { %3554 = vmatprep.subr.bf16.mxu0 %v4069_v16 }
 0x444   :  { %v1290_v10 = vpop.f32.mrb[18].mxu0 }
 0x445   :  { %v1291_v57 = vadd.f32 %v4510_v18, %v1290_v10  ;;  %v2954_v31 = vpop.f32.mrb[19].mxu0 }
 0x446   :  { %v1451_v63 = vpop.f32.mrb[6].mxu1 }
 0x447   :  { %2688 = vst [vmem:[%s4918_s9 + $0x10] sm:$0xff] %v1291_v57  ;;  %v1453_v32 = vpop.f32.mrb[7].mxu1  ;;  %v3864_v62 = vadd.f32 %v1451_v63, %v4443_v55  ;;  %v2694_v63 = vld [vmem:[%s4910_s1 + $0x20] sm:$0xff] }
 0x448   :  { %v3865_v51 = vadd.f32 %v1453_v32, %v4440_v45 }
 0x44a   :  { %v2692_v6 = vmul.f32 -1.442695, %v3865_v51 }
 0x464   :  { %v1380_v20 = vpop.f32.mrb[6].mxu0 }
 0x465   :  { %v3848_v40 = vadd.f32 %v1380_v20, %v4434_v12  ;;  %v1382_v37 = vpop.f32.mrb[7].mxu0 }
 0x466   :  { %v3849_v27 = vadd.f32 %v1382_v37, %v4436_v13 }
 0x467   :  { %v2690_v44 = vmul.f32 -1.442695, %v3848_v40 }
 0x468   :  { %v2691_v49 = vmul.f32 -1.442695, %v3849_v27 }
 0x469   :  { %3960 = vpow2.f32 %v2690_v44 }
 0x46a   :  { %3962 = vpow2.f32 %v2691_v49 }
 0x46b   :  { %3964 = vpow2.f32 %v2692_v6 }
 0x46c   :  { %3966 = vtanh.f32 %v3864_v62 }
 0x473   :  { %v3961_v3 = vpop.eup %3960 }
 0x474   :  { %v3963_v7 = vpop.eup %3962  ;;  %v1463_v10 = vadd.f32 1.0, %v3961_v3 }
 0x475   :  { %v1469_v57 = vadd.f32 1.0, %v3963_v7  ;;  %v3965_v31 = vpop.eup %3964 }
 0x476   :  { %3968 = vrcp.f32 %v1463_v10  ;;  %v3967_v20 = vpop.eup %3966  ;;  %v1476_v27 = vadd.f32 1.0, %v3965_v31 }
 0x477   :  { %3970 = vrcp.f32 %v1469_v57 }
 0x478   :  { %3972 = vrcp.f32 %v1476_v27 }
 0x480   :  { %v3969_v37 = vpop.eup %3968 }
 0x481   :  { %v3971_v40 = vpop.eup %3970  ;;  %v1480_v44 = vmul.f32 %v3969_v37, %v3967_v20 }
 0x482   :  { %v1479_v49 = vmul.f32 %v3971_v40, %v4590_v26  ;;  %v3973_v6 = vpop.eup %3972 }
 0x484   :  { %v1481_v32 = vadd.f32 %v1480_v44, %v1479_v49 }
 0x486   :  { %3974 = vtanh.f32 %v1481_v32  ;;  %v4656_v51 = vmul.f32 %v2694_v63, %v1481_v32 }
 0x490   :  { %v3975_v62 = vpop.eup %3974 }
 0x491   :  { %v1483_v3 = vmul.f32 %v3975_v62, %v3973_v6 }
 0x493   :  { %2988 = vmatmul.mubr.f32.vlgmr.msra.gmra.mrb[18].mxu1 %v1483_v3  ;;  %v1565_v7 = vmul.f32 %v2694_v63, %v1483_v3 }
 0x494   :  { %3525 = vmatpush1.bf16.msra.mxu1 %v4179_v25  ;;  %1709 = vmatprep.mubr.f32.mxu1 %v4068_v0 }
 0x495   :  { %1639 = vmatmul.mubr.f32.vlgmr.msra.gmra.mrb[8].mxu0 %v1565_v7  ;;  %3527 = vmatprep.subr.bf16.mxu1 %v4190_v34 }
 0x496   :  { %3556 = vmatpush3.bf16.msra.mxu0 %v4353_v14  ;;  %3022 = vmatprep.mubr.msk.f32.mxu0 %vm4070_vm1, %v4068_v0 }
 0x497   :  { %3557 = vmatprep.subr.bf16.mxu0 %v4069_v16 }
 0x498   :  { %3529 = vmatpush1.bf16.msra.mxu1 %v4196_v38 }
 0x499   :  { %3531 = vmatprep.subr.bf16.mxu1 %v4207_v47 }
 0x49a   :  { %3559 = vmatpush3.bf16.msra.mxu0 %v4365_v23 }
 0x49b   :  { %3560 = vmatprep.subr.bf16.mxu0 %v4069_v16 }
 0x49c   :  { %3533 = vmatpush1.bf16.msra.mxu1 %v4215_v54 }
 0x49d   :  { %3535 = vmatprep.subr.bf16.mxu1 %v4223_v61 }
 0x49e   :  { %3562 = vmatpush3.bf16.msra.mxu0 %v4375_v30 }
 0x49f   :  { %3563 = vmatprep.subr.bf16.mxu0 %v4069_v16 }
 0x4a0   :  { %3537 = vmatpush1.bf16.msra.mxu1 %v4234_v5 }
 0x4a1   :  { %3539 = vmatprep.subr.bf16.mxu1 %v4242_v11 }
 0x4a2   :  { %3565 = vmatpush3.bf16.msra.mxu0 %v4385_v36 }
 0x4a3   :  { %3566 = vmatprep.subr.bf16.mxu0 %v4069_v16 }
 0x4a4   :  { %3541 = vmatpush1.bf16.msra.mxu1 %v4253_v19 }
 0x4a5   :  { %3543 = vmatprep.subr.bf16.mxu1 %v4261_v28 }
 0x4a6   :  { %3568 = vmatpush3.bf16.msra.mxu0 %v4395_v41 }
 0x4a7   :  { %3569 = vmatprep.subr.bf16.mxu0 %v4069_v16 }
 0x4a8   :  { %3545 = vmatpush1.bf16.msra.mxu1 %v4272_v39 }
 0x4a9   :  { %3547 = vmatprep.subr.bf16.mxu1 %v4280_v46 }
 0x4aa   :  { %3571 = vmatpush3.bf16.msra.mxu0 %v4405_v48 }
 0x4ab   :  { %3572 = vmatprep.subr.bf16.mxu0 %v4069_v16 }
 0x4ac   :  { %3549 = vmatpush1.bf16.msra.mxu1 %v4291_v56 }
 0x4ad   :  { %3551 = vmatprep.subr.bf16.mxu1 %v4299_v1 }
 0x4ae   :  { %3574 = vmatpush3.bf16.msra.mxu0 %v4416_v53 }
 0x4af   :  { %3575 = vmatprep.subr.bf16.mxu0 %v4069_v16 }
 0x4b0   :  { %3553 = vmatpush1.bf16.msra.mxu1 %v4318_v9 }
 0x4b1   :  { %3611 = vmatprep.subr.bf16.mxu1 %v4174_v21 }
 0x4b2   :  { %3577 = vmatpush3.bf16.msra.mxu0 %v4426_v59 }
 0x4b3   :  { %1710 = vmatmul.mubr.f32.vlgmr.msra.gmra.mrb[8].mxu1 %v1565_v7  ;;  %3579 = vmatprep.subr.bf16.mxu0 %v4172_v17 }
 0x4b4   :  { %3613 = vmatpush1.bf16.msra.mxu1 %v4179_v25  ;;  %1969 = vmatprep.mubr.f32.mxu1 %v4068_v0 }
 0x4b5   :  { %3615 = vmatprep.subr.bf16.mxu1 %v4190_v34 }
 0x4b8   :  { %3617 = vmatpush1.bf16.msra.mxu1 %v4196_v38 }
 0x4b9   :  { %3619 = vmatprep.subr.bf16.mxu1 %v4207_v47 }
 0x4bc   :  { %3621 = vmatpush1.bf16.msra.mxu1 %v4215_v54 }
 0x4bd   :  { %3623 = vmatprep.subr.bf16.mxu1 %v4223_v61 }
 0x4c0   :  { %3625 = vmatpush1.bf16.msra.mxu1 %v4234_v5 }
 0x4c1   :  { %3627 = vmatprep.subr.bf16.mxu1 %v4242_v11 }
 0x4c4   :  { %3629 = vmatpush1.bf16.msra.mxu1 %v4253_v19 }
 0x4c5   :  { %3631 = vmatprep.subr.bf16.mxu1 %v4261_v28 }
 0x4c8   :  { %3633 = vmatpush1.bf16.msra.mxu1 %v4272_v39 }
 0x4c9   :  { %3635 = vmatprep.subr.bf16.mxu1 %v4280_v46 }
 0x4cc   :  { %3637 = vmatpush1.bf16.msra.mxu1 %v4291_v56 }
 0x4cd   :  { %3639 = vmatprep.subr.bf16.mxu1 %v4299_v1 }
 0x4d0   :  { %3641 = vmatpush1.bf16.msra.mxu1 %v4318_v9 }
 0x4d1   :  { %3642 = vmatprep.subr.bf16.mxu1 %v4069_v16 }
 0x566   :  { %v1550_v26 = vpop.f32.mrb[18].mxu1 }
 0x567   :  { %v1551_v10 = vadd.f32 %v4510_v18, %v1550_v26  ;;  %v2989_v57 = vpop.f32.mrb[19].mxu1 }
 0x568   :  { %v1640_v31 = vpop.f32.mrb[8].mxu0 }
 0x569   :  { %2693 = vst [vmem:[%s4918_s9 + $0x18] sm:$0xff] %v1551_v10  ;;  %v1642_v20 = vpop.f32.mrb[9].mxu0  ;;  %v3850_v27 = vadd.f32 %v1640_v31, %v4434_v12 }
 0x56a   :  { %v3851_v37 = vadd.f32 %v1642_v20, %v4436_v13 }
 0x56b   :  { %v2695_v44 = vmul.f32 -1.442695, %v3850_v27  ;;  %v2699_v27 = vld [vmem:[%s4910_s1 + $0x28] sm:$0xff] }
 0x56c   :  { %v2696_v40 = vmul.f32 -1.442695, %v3851_v37 }
 0x56e   :  { %3976 = vpow2.f32 %v2696_v40 }
 0x56f   :  { %3978 = vpow2.f32 %v2695_v44 }
 0x578   :  { %v3977_v49 = vpop.eup %3976 }
 0x579   :  { %v1729_v63 = vadd.f32 1.0, %v3977_v49  ;;  %v3979_v32 = vpop.eup %3978 }
 0x57a   :  { %v1723_v6 = vadd.f32 1.0, %v3979_v32 }
 0x57b   :  { %3980 = vrcp.f32 %v1729_v63 }
 0x57c   :  { %3982 = vrcp.f32 %v1723_v6 }
 0x585   :  { %v3981_v62 = vpop.eup %3980 }
 0x586   :  { %v1739_v3 = vmul.f32 %v3981_v62, %v4656_v51  ;;  %v1711_v7 = vpop.f32.mrb[8].mxu1  ;;  %v3983_v31 = vpop.eup %3982 }
 0x587   :  { %v3866_v26 = vadd.f32 %v1711_v7, %v4443_v55  ;;  %v1713_v10 = vpop.f32.mrb[9].mxu1 }
 0x588   :  { %v3867_v57 = vadd.f32 %v1713_v10, %v4440_v45 }
 0x589   :  { %3984 = vtanh.f32 %v3866_v26 }
 0x58a   :  { %v2697_v20 = vmul.f32 -1.442695, %v3867_v57 }
 0x58c   :  { %3986 = vpow2.f32 %v2697_v20 }
 0x593   :  { %v3985_v37 = vpop.eup %3984 }
 0x594   :  { %v1740_v40 = vmul.f32 %v3985_v37, %v3983_v31 }
 0x596   :  { %v3987_v44 = vpop.eup %3986  ;;  %v1741_v49 = vadd.f32 %v1740_v40, %v1739_v3 }
 0x597   :  { %v1736_v51 = vadd.f32 1.0, %v3987_v44 }
 0x598   :  { %3988 = vtanh.f32 %v1741_v49  ;;  %v4722_v63 = vmul.f32 %v2699_v27, %v1741_v49 }
 0x599   :  { %3990 = vrcp.f32 %v1736_v51 }
 0x5a2   :  { %v3989_v32 = vpop.eup %3988 }
 0x5a3   :  { %v3991_v6 = vpop.eup %3990 }
 0x5a4   :  { %v1743_v62 = vmul.f32 %v3991_v6, %v3989_v32 }
 0x5a6   :  { %3023 = vmatmul.mubr.f32.vlgmr.msra.gmra.mrb[20].mxu0 %v1743_v62  ;;  %v1825_v7 = vmul.f32 %v2699_v27, %v1743_v62 }
 0x5a7   :  { %3581 = vmatpush1.bf16.msra.mxu0 %v4176_v22  ;;  %1898 = vmatprep.mubr.f32.mxu0 %v4068_v0 }
 0x5a8   :  { %1970 = vmatmul.mubr.f32.vlgmr.msra.gmra.mrb[10].mxu1 %v1825_v7  ;;  %3583 = vmatprep.subr.bf16.mxu0 %v4183_v29 }
 0x5a9   :  { %3644 = vmatpush3.bf16.msra.mxu1 %v4353_v14  ;;  %3057 = vmatprep.mubr.msk.f32.mxu1 %vm4070_vm1, %v4068_v0 }
 0x5aa   :  { %3645 = vmatprep.subr.bf16.mxu1 %v4069_v16 }
 0x5ab   :  { %3585 = vmatpush1.bf16.msra.mxu0 %v4192_v35 }
 0x5ac   :  { %3587 = vmatprep.subr.bf16.mxu0 %v4200_v42 }
 0x5ad   :  { %3647 = vmatpush3.bf16.msra.mxu1 %v4365_v23 }
 0x5ae   :  { %3648 = vmatprep.subr.bf16.mxu1 %v4069_v16 }
 0x5af   :  { %3589 = vmatpush1.bf16.msra.mxu0 %v4211_v50 }
 0x5b0   :  { %3591 = vmatprep.subr.bf16.mxu0 %v4219_v58 }
 0x5b1   :  { %3650 = vmatpush3.bf16.msra.mxu1 %v4375_v30 }
 0x5b2   :  { %3651 = vmatprep.subr.bf16.mxu1 %v4069_v16 }
 0x5b3   :  { %3593 = vmatpush1.bf16.msra.mxu0 %v4230_v2 }
 0x5b4   :  { %3595 = vmatprep.subr.bf16.mxu0 %v4238_v8 }
 0x5b5   :  { %3653 = vmatpush3.bf16.msra.mxu1 %v4385_v36 }
 0x5b6   :  { %3654 = vmatprep.subr.bf16.mxu1 %v4069_v16 }
 0x5b7   :  { %3597 = vmatpush1.bf16.msra.mxu0 %v4249_v15 }
 0x5b8   :  { %3599 = vmatprep.subr.bf16.mxu0 %v4257_v24 }
 0x5b9   :  { %3656 = vmatpush3.bf16.msra.mxu1 %v4395_v41 }
 0x5ba   :  { %3657 = vmatprep.subr.bf16.mxu1 %v4069_v16 }
 0x5bb   :  { %3601 = vmatpush1.bf16.msra.mxu0 %v4268_v33 }
 0x5bc   :  { %3603 = vmatprep.subr.bf16.mxu0 %v4276_v43 }
 0x5bd   :  { %3659 = vmatpush3.bf16.msra.mxu1 %v4405_v48 }
 0x5be   :  { %3660 = vmatprep.subr.bf16.mxu1 %v4069_v16 }
 0x5bf   :  { %3605 = vmatpush1.bf16.msra.mxu0 %v4287_v52 }
 0x5c0   :  { %3607 = vmatprep.subr.bf16.mxu0 %v4295_v60 }
 0x5c1   :  { %3662 = vmatpush3.bf16.msra.mxu1 %v4416_v53 }
 0x5c2   :  { %3663 = vmatprep.subr.bf16.mxu1 %v4069_v16 }
 0x5c3   :  { %3609 = vmatpush1.bf16.msra.mxu0 %v4306_v4 }
 0x5c4   :  { %3667 = vmatprep.subr.bf16.mxu0 %v4172_v17 }
 0x5c5   :  { %3665 = vmatpush3.bf16.msra.mxu1 %v4426_v59 }
 0x5c6   :  { %1899 = vmatmul.mubr.f32.vlgmr.msra.gmra.mrb[10].mxu0 %v1825_v7  ;;  %3699 = vmatprep.subr.bf16.mxu1 %v4174_v21 }
 0x5c7   :  { %3669 = vmatpush1.bf16.msra.mxu0 %v4176_v22  ;;  %2158 = vmatprep.mubr.f32.mxu0 %v4068_v0 }
 0x5c8   :  { %3671 = vmatprep.subr.bf16.mxu0 %v4183_v29 }
 0x5cb   :  { %3673 = vmatpush1.bf16.msra.mxu0 %v4192_v35 }
 0x5cc   :  { %3675 = vmatprep.subr.bf16.mxu0 %v4200_v42 }
 0x5cf   :  { %3677 = vmatpush1.bf16.msra.mxu0 %v4211_v50 }
 0x5d0   :  { %3679 = vmatprep.subr.bf16.mxu0 %v4219_v58 }
 0x5d3   :  { %3681 = vmatpush1.bf16.msra.mxu0 %v4230_v2 }
 0x5d4   :  { %3683 = vmatprep.subr.bf16.mxu0 %v4238_v8 }
 0x5d7   :  { %3685 = vmatpush1.bf16.msra.mxu0 %v4249_v15 }
 0x5d8   :  { %3687 = vmatprep.subr.bf16.mxu0 %v4257_v24 }
 0x5db   :  { %3689 = vmatpush1.bf16.msra.mxu0 %v4268_v33 }
 0x5dc   :  { %3691 = vmatprep.subr.bf16.mxu0 %v4276_v43 }
 0x5df   :  { %3693 = vmatpush1.bf16.msra.mxu0 %v4287_v52 }
 0x5e0   :  { %3695 = vmatprep.subr.bf16.mxu0 %v4295_v60 }
 0x5e3   :  { %3697 = vmatpush1.bf16.msra.mxu0 %v4306_v4 }
 0x5e4   :  { %3730 = vmatprep.subr.bf16.mxu0 %v4069_v16 }
 0x679   :  { %v1810_v3 = vpop.f32.mrb[20].mxu0 }
 0x67a   :  { %v1811_v26 = vadd.f32 %v4510_v18, %v1810_v3  ;;  %v3024_v10 = vpop.f32.mrb[21].mxu0 }
 0x67b   :  { %v1971_v57 = vpop.f32.mrb[10].mxu1 }
 0x67c   :  { %2698 = vst [vmem:[%s4918_s9 + $0x20] sm:$0xff] %v1811_v26  ;;  %v1973_v20 = vpop.f32.mrb[11].mxu1  ;;  %v3868_v6 = vadd.f32 %v1971_v57, %v4443_v55  ;;  %v2704_v57 = vld [vmem:[%s4910_s1 + $0x30] sm:$0xff] }
 0x67d   :  { %v3869_v51 = vadd.f32 %v1973_v20, %v4440_v45 }
 0x67f   :  { %v2702_v32 = vmul.f32 -1.442695, %v3869_v51 }
 0x699   :  { %v1900_v31 = vpop.f32.mrb[10].mxu0 }
 0x69a   :  { %v3852_v37 = vadd.f32 %v1900_v31, %v4434_v12  ;;  %v1902_v40 = vpop.f32.mrb[11].mxu0 }
 0x69b   :  { %v3853_v27 = vadd.f32 %v1902_v40, %v4436_v13 }
 0x69c   :  { %v2700_v44 = vmul.f32 -1.442695, %v3852_v37 }
 0x69d   :  { %v2701_v49 = vmul.f32 -1.442695, %v3853_v27 }
 0x69e   :  { %3992 = vpow2.f32 %v2700_v44 }
 0x69f   :  { %3994 = vpow2.f32 %v2701_v49 }
 0x6a0   :  { %3996 = vpow2.f32 %v2702_v32 }
 0x6a1   :  { %3998 = vtanh.f32 %v3868_v6 }
 0x6a8   :  { %v3993_v62 = vpop.eup %3992 }
 0x6a9   :  { %v3995_v7 = vpop.eup %3994  ;;  %v1983_v3 = vadd.f32 1.0, %v3993_v62 }
 0x6aa   :  { %v1989_v26 = vadd.f32 1.0, %v3995_v7  ;;  %v3997_v10 = vpop.eup %3996 }
 0x6ab   :  { %4000 = vrcp.f32 %v1983_v3  ;;  %v3999_v31 = vpop.eup %3998  ;;  %v1996_v27 = vadd.f32 1.0, %v3997_v10 }
 0x6ac   :  { %4002 = vrcp.f32 %v1989_v26 }
 0x6ad   :  { %4004 = vrcp.f32 %v1996_v27 }
 0x6b5   :  { %v4001_v40 = vpop.eup %4000 }
 0x6b6   :  { %v4003_v37 = vpop.eup %4002  ;;  %v2000_v44 = vmul.f32 %v4001_v40, %v3999_v31  ;;  %v2709_v40 = vld [vmem:[%s4910_s1 + $0x38] sm:$0xff] }
 0x6b7   :  { %v1999_v49 = vmul.f32 %v4003_v37, %v4722_v63  ;;  %v4005_v32 = vpop.eup %4004 }
 0x6b9   :  { %v2001_v20 = vadd.f32 %v2000_v44, %v1999_v49 }
 0x6bb   :  { %4006 = vtanh.f32 %v2001_v20  ;;  %v4788_v51 = vmul.f32 %v2704_v57, %v2001_v20 }
 0x6c5   :  { %v4007_v6 = vpop.eup %4006 }
 0x6c6   :  { %v2003_v62 = vmul.f32 %v4007_v6, %v4005_v32 }
 0x6c8   :  { %3058 = vmatmul.mubr.f32.vlgmr.msra.gmra.mrb[20].mxu1 %v2003_v62  ;;  %v2085_v7 = vmul.f32 %v2704_v57, %v2003_v62 }
 0x6c9   :  { %3701 = vmatpush1.bf16.msra.mxu1 %v4179_v25  ;;  %2229 = vmatprep.mubr.f32.mxu1 %v4068_v0 }
 0x6ca   :  { %2159 = vmatmul.mubr.f32.vlgmr.msra.gmra.mrb[12].mxu0 %v2085_v7  ;;  %3703 = vmatprep.subr.bf16.mxu1 %v4190_v34 }
 0x6cb   :  { %3732 = vmatpush3.bf16.msra.mxu0 %v4353_v14  ;;  %3092 = vmatprep.mubr.msk.f32.mxu0 %vm4070_vm1, %v4068_v0 }
 0x6cc   :  { %3733 = vmatprep.subr.bf16.mxu0 %v4069_v16 }
 0x6cd   :  { %3705 = vmatpush1.bf16.msra.mxu1 %v4196_v38 }
 0x6ce   :  { %3707 = vmatprep.subr.bf16.mxu1 %v4207_v47 }
 0x6cf   :  { %3735 = vmatpush3.bf16.msra.mxu0 %v4365_v23 }
 0x6d0   :  { %3736 = vmatprep.subr.bf16.mxu0 %v4069_v16 }
 0x6d1   :  { %3709 = vmatpush1.bf16.msra.mxu1 %v4215_v54 }
 0x6d2   :  { %3711 = vmatprep.subr.bf16.mxu1 %v4223_v61 }
 0x6d3   :  { %3738 = vmatpush3.bf16.msra.mxu0 %v4375_v30 }
 0x6d4   :  { %3739 = vmatprep.subr.bf16.mxu0 %v4069_v16 }
 0x6d5   :  { %3713 = vmatpush1.bf16.msra.mxu1 %v4234_v5 }
 0x6d6   :  { %3715 = vmatprep.subr.bf16.mxu1 %v4242_v11 }
 0x6d7   :  { %3741 = vmatpush3.bf16.msra.mxu0 %v4385_v36 }
 0x6d8   :  { %3742 = vmatprep.subr.bf16.mxu0 %v4069_v16 }
 0x6d9   :  { %3717 = vmatpush1.bf16.msra.mxu1 %v4253_v19 }
 0x6da   :  { %3719 = vmatprep.subr.bf16.mxu1 %v4261_v28 }
 0x6db   :  { %3744 = vmatpush3.bf16.msra.mxu0 %v4395_v41 }
 0x6dc   :  { %3745 = vmatprep.subr.bf16.mxu0 %v4069_v16 }
 0x6dd   :  { %3721 = vmatpush1.bf16.msra.mxu1 %v4272_v39 }
 0x6de   :  { %3723 = vmatprep.subr.bf16.mxu1 %v4280_v46 }
 0x6df   :  { %3747 = vmatpush3.bf16.msra.mxu0 %v4405_v48 }
 0x6e0   :  { %3748 = vmatprep.subr.bf16.mxu0 %v4069_v16 }
 0x6e1   :  { %3725 = vmatpush1.bf16.msra.mxu1 %v4291_v56 }
 0x6e2   :  { %3727 = vmatprep.subr.bf16.mxu1 %v4299_v1 }
 0x6e3   :  { %3750 = vmatpush3.bf16.msra.mxu0 %v4416_v53 }
 0x6e4   :  { %3751 = vmatprep.subr.bf16.mxu0 %v4069_v16 }
 0x6e5   :  { %3729 = vmatpush1.bf16.msra.mxu1 %v4318_v9 }
 0x6e6   :  { %3787 = vmatprep.subr.bf16.mxu1 %v4174_v21 }
 0x6e7   :  { %3753 = vmatpush3.bf16.msra.mxu0 %v4426_v59 }
 0x6e8   :  { %2230 = vmatmul.mubr.f32.vlgmr.msra.gmra.mrb[12].mxu1 %v2085_v7  ;;  %3755 = vmatprep.subr.bf16.mxu0 %v4172_v17 }
 0x6e9   :  { %3789 = vmatpush1.bf16.msra.mxu1 %v4179_v25  ;;  %2489 = vmatprep.mubr.f32.mxu1 %v4068_v0 }
 0x6ea   :  { %3791 = vmatprep.subr.bf16.mxu1 %v4190_v34 }
 0x6ed   :  { %3793 = vmatpush1.bf16.msra.mxu1 %v4196_v38 }
 0x6ee   :  { %3795 = vmatprep.subr.bf16.mxu1 %v4207_v47 }
 0x6f1   :  { %3797 = vmatpush1.bf16.msra.mxu1 %v4215_v54 }
 0x6f2   :  { %3799 = vmatprep.subr.bf16.mxu1 %v4223_v61 }
 0x6f5   :  { %3801 = vmatpush1.bf16.msra.mxu1 %v4234_v5 }
 0x6f6   :  { %3803 = vmatprep.subr.bf16.mxu1 %v4242_v11 }
 0x6f9   :  { %3805 = vmatpush1.bf16.msra.mxu1 %v4253_v19 }
 0x6fa   :  { %3807 = vmatprep.subr.bf16.mxu1 %v4261_v28 }
 0x6fd   :  { %3809 = vmatpush1.bf16.msra.mxu1 %v4272_v39 }
 0x6fe   :  { %3811 = vmatprep.subr.bf16.mxu1 %v4280_v46 }
 0x701   :  { %3813 = vmatpush1.bf16.msra.mxu1 %v4291_v56 }
 0x702   :  { %3815 = vmatprep.subr.bf16.mxu1 %v4299_v1 }
 0x705   :  { %3817 = vmatpush1.bf16.msra.mxu1 %v4318_v9 }
 0x706   :  { %3818 = vmatprep.subr.bf16.mxu1 %v4069_v16 }
 0x79b   :  { %v2070_v17 = vpop.f32.mrb[20].mxu1 }
 0x79c   :  { %v2071_v21 = vadd.f32 %v4510_v18, %v2070_v17  ;;  %v3059_v25 = vpop.f32.mrb[21].mxu1 }
 0x79d   :  { %v2160_v34 = vpop.f32.mrb[12].mxu0 }
 0x79e   :  { %2703 = vst [vmem:[%s4918_s9 + $0x28] sm:$0xff] %v2071_v21  ;;  %v2162_v38 = vpop.f32.mrb[13].mxu0  ;;  %v3854_v61 = vadd.f32 %v2160_v34, %v4434_v12 }
 0x79f   :  { %v3855_v47 = vadd.f32 %v2162_v38, %v4436_v13 }
 0x7a0   :  { %v2705_v5 = vmul.f32 -1.442695, %v3854_v61 }
 0x7a1   :  { %v2706_v54 = vmul.f32 -1.442695, %v3855_v47 }
 0x7a3   :  { %4008 = vpow2.f32 %v2706_v54 }
 0x7a4   :  { %4010 = vpow2.f32 %v2705_v5 }
 0x7ad   :  { %v4009_v11 = vpop.eup %4008 }
 0x7ae   :  { %v2249_v19 = vadd.f32 1.0, %v4009_v11  ;;  %v4011_v28 = vpop.eup %4010 }
 0x7af   :  { %v2243_v39 = vadd.f32 1.0, %v4011_v28 }
 0x7b0   :  { %4012 = vrcp.f32 %v2249_v19 }
 0x7b1   :  { %4014 = vrcp.f32 %v2243_v39 }
 0x7ba   :  { %v4013_v46 = vpop.eup %4012 }
 0x7bb   :  { %v2259_v56 = vmul.f32 %v4013_v46, %v4788_v51  ;;  %v2231_v1 = vpop.f32.mrb[12].mxu1  ;;  %v4015_v26 = vpop.eup %4014 }
 0x7bc   :  { %v3870_v9 = vadd.f32 %v2231_v1, %v4443_v55  ;;  %v2233_v18 = vpop.f32.mrb[13].mxu1 }
 0x7bd   :  { %v3871_v63 = vadd.f32 %v2233_v18, %v4440_v45 }
 0x7be   :  { %4016 = vtanh.f32 %v3870_v9 }
 0x7bf   :  { %v2707_v3 = vmul.f32 -1.442695, %v3871_v63 }
 0x7c1   :  { %4018 = vpow2.f32 %v2707_v3 }
 0x7c8   :  { %v4017_v10 = vpop.eup %4016 }
 0x7c9   :  { %v2260_v31 = vmul.f32 %v4017_v10, %v4015_v26 }
 0x7cb   :  { %v4019_v37 = vpop.eup %4018  ;;  %v2261_v27 = vadd.f32 %v2260_v31, %v2259_v56 }
 0x7cc   :  { %v2256_v44 = vadd.f32 1.0, %v4019_v37 }
 0x7cd   :  { %4020 = vtanh.f32 %v2261_v27  ;;  %v4854_v49 = vmul.f32 %v2709_v40, %v2261_v27 }
 0x7ce   :  { %4022 = vrcp.f32 %v2256_v44 }
 0x7d7   :  { %v4021_v57 = vpop.eup %4020 }
 0x7d8   :  { %v4023_v20 = vpop.eup %4022 }
 0x7d9   :  { %v2263_v51 = vmul.f32 %v4023_v20, %v4021_v57 }
 0x7db   :  { %3093 = vmatmul.mubr.f32.vlgmr.msra.gmra.mrb[22].mxu0 %v2263_v51  ;;  %v2345_v32 = vmul.f32 %v2709_v40, %v2263_v51 }
 0x7dc   :  { %3757 = vmatpush1.bf16.msra.mxu0 %v4176_v22  ;;  %2418 = vmatprep.mubr.f32.mxu0 %v4068_v0  ;;  %v4040_v22 = vld [vmem:[%s4917_s8] ss:$0 sm:$0xff] }
 0x7dd   :  { %2490 = vmatmul.mubr.f32.vlgmr.msra.gmra.mrb[14].mxu1 %v2345_v32  ;;  %3759 = vmatprep.subr.bf16.mxu0 %v4183_v29 }
 0x7de   :  { %3820 = vmatpush3.bf16.msra.mxu1 %v4353_v14  ;;  %3127 = vmatprep.mubr.msk.f32.mxu1 %vm4070_vm1, %v4068_v0 }
 0x7df   :  { %3821 = vmatprep.subr.bf16.mxu1 %v4069_v16 }
 0x7e0   :  { %3761 = vmatpush1.bf16.msra.mxu0 %v4192_v35 }
 0x7e1   :  { %3763 = vmatprep.subr.bf16.mxu0 %v4200_v42 }
 0x7e2   :  { %3823 = vmatpush3.bf16.msra.mxu1 %v4365_v23 }
 0x7e3   :  { %3824 = vmatprep.subr.bf16.mxu1 %v4069_v16 }
 0x7e4   :  { %3765 = vmatpush1.bf16.msra.mxu0 %v4211_v50 }
 0x7e5   :  { %3767 = vmatprep.subr.bf16.mxu0 %v4219_v58 }
 0x7e6   :  { %3826 = vmatpush3.bf16.msra.mxu1 %v4375_v30 }
 0x7e7   :  { %3827 = vmatprep.subr.bf16.mxu1 %v4069_v16 }
 0x7e8   :  { %3769 = vmatpush1.bf16.msra.mxu0 %v4230_v2 }
 0x7e9   :  { %3771 = vmatprep.subr.bf16.mxu0 %v4238_v8 }
 0x7ea   :  { %3829 = vmatpush3.bf16.msra.mxu1 %v4385_v36 }
 0x7eb   :  { %3830 = vmatprep.subr.bf16.mxu1 %v4069_v16 }
 0x7ec   :  { %3773 = vmatpush1.bf16.msra.mxu0 %v4249_v15 }
 0x7ed   :  { %3775 = vmatprep.subr.bf16.mxu0 %v4257_v24 }
 0x7ee   :  { %3832 = vmatpush3.bf16.msra.mxu1 %v4395_v41 }
 0x7ef   :  { %3833 = vmatprep.subr.bf16.mxu1 %v4069_v16 }
 0x7f0   :  { %3777 = vmatpush1.bf16.msra.mxu0 %v4268_v33 }
 0x7f1   :  { %3779 = vmatprep.subr.bf16.mxu0 %v4276_v43 }
 0x7f2   :  { %3835 = vmatpush3.bf16.msra.mxu1 %v4405_v48 }
 0x7f3   :  { %3836 = vmatprep.subr.bf16.mxu1 %v4069_v16 }
 0x7f4   :  { %3781 = vmatpush1.bf16.msra.mxu0 %v4287_v52 }
 0x7f5   :  { %3783 = vmatprep.subr.bf16.mxu0 %v4295_v60 }
 0x7f6   :  { %3838 = vmatpush3.bf16.msra.mxu1 %v4416_v53 }
 0x7f7   :  { %3839 = vmatprep.subr.bf16.mxu1 %v4069_v16 }
 0x7f8   :  { %3785 = vmatpush1.bf16.msra.mxu0 %v4306_v4 }
 0x7fa   :  { %3841 = vmatpush3.bf16.msra.mxu1 %v4426_v59 }
 0x7fb   :  { %2419 = vmatmul.mubr.f32.vlgmr.msra.gmra.mrb[14].mxu0 %v2345_v32 }
 0x8ae   :  { %v2330_v0 = vpop.f32.mrb[22].mxu0 }
 0x8af   :  { %v2331_v29 = vadd.f32 %v4040_v22, %v2330_v0  ;;  %v3094_v35 = vpop.f32.mrb[23].mxu0 }
 0x8b0   :  { %v2491_v42 = vpop.f32.mrb[14].mxu1 }
 0x8b1   :  { %2708 = vst [vmem:[%s4918_s9 + $0x30] sm:$0xff] %v2331_v29  ;;  %v2493_v50 = vpop.f32.mrb[15].mxu1  ;;  %v3872_v60 = vadd.f32 %v2491_v42, %v4443_v55 }
 0x8b2   :  { %v3873_v43 = vadd.f32 %v2493_v50, %v4440_v45 }
 0x8b4   :  { %v2712_v52 = vmul.f32 -1.442695, %v3873_v43 }
 0x8ce   :  { %v2420_v58 = vpop.f32.mrb[14].mxu0 }
 0x8cf   :  { %v3856_v2 = vadd.f32 %v2420_v58, %v4434_v12  ;;  %v2422_v8 = vpop.f32.mrb[15].mxu0 }
 0x8d0   :  { %v3857_v15 = vadd.f32 %v2422_v8, %v4436_v13 }
 0x8d1   :  { %v2710_v24 = vmul.f32 -1.442695, %v3856_v2 }
 0x8d2   :  { %v2711_v33 = vmul.f32 -1.442695, %v3857_v15 }
 0x8d3   :  { %4024 = vpow2.f32 %v2710_v24 }
 0x8d4   :  { %4026 = vpow2.f32 %v2711_v33 }
 0x8d5   :  { %4028 = vpow2.f32 %v2712_v52 }
 0x8d6   :  { %4030 = vtanh.f32 %v3872_v60 }
 0x8dd   :  { %v4025_v4 = vpop.eup %4024 }
 0x8de   :  { %v4027_v14 = vpop.eup %4026  ;;  %v2503_v16 = vadd.f32 1.0, %v4025_v4 }
 0x8df   :  { %v2509_v23 = vadd.f32 1.0, %v4027_v14  ;;  %v4029_v30 = vpop.eup %4028 }
 0x8e0   :  { %4032 = vrcp.f32 %v2503_v16  ;;  %v4031_v36 = vpop.eup %4030  ;;  %v2516_v53 = vadd.f32 1.0, %v4029_v30 }
 0x8e1   :  { %4034 = vrcp.f32 %v2509_v23 }
 0x8e2   :  { %4036 = vrcp.f32 %v2516_v53 }
 0x8ea   :  { %v4033_v41 = vpop.eup %4032 }
 0x8eb   :  { %v4035_v48 = vpop.eup %4034  ;;  %v2520_v59 = vmul.f32 %v4033_v41, %v4031_v36 }
 0x8ec   :  { %v2519_v12 = vmul.f32 %v4035_v48, %v4854_v49  ;;  %v4037_v45 = vpop.eup %4036 }
 0x8ee   :  { %v2521_v13 = vadd.f32 %v2520_v59, %v2519_v12 }
 0x8f0   :  { %2602 = vst [vmem:[%s4920_s11] sm:$0xff] %v2521_v13  ;;  %4038 = vtanh.f32 %v2521_v13 }
 0x8fa   :  { %v4039_v55 = vpop.eup %4038 }
 0x8fb   :  { %v2523_v6 = vmul.f32 %v4039_v55, %v4037_v45 }
 0x8fd   :  { %3128 = vmatmul.mubr.f32.vlgmr.msra.gmra.mrb[22].mxu1 %v2523_v6  ;;  %2601 = vst [vmem:[%s4919_s10] sm:$0xff] %v2523_v6 }
 0x9d0   :  { %v2590_v62 = vpop.f32.mrb[22].mxu1 }
 0x9d1   :  { %v2591_v7 = vadd.f32 %v4040_v22, %v2590_v62  ;;  %v3129_v17 = vpop.f32.mrb[23].mxu1 }
 0x9d3   :  { %2713 = vst [vmem:[%s4918_s9 + $0x38] sm:$0xff] %v2591_v7 }
 0x9d4   :  { %2631 = vsyncpa [#allocation6], 1 }

</bundles_post_ra>
